<compile_context>
chip_gen: v5e
topology: v5e:2x2
jax: 0.10.0
libtpu: 0.0.40
codegen_flags: <defaults>
</compile_context>

<pallas_src>
import math
import functools

import jax
import jax.numpy as jnp
from jax.experimental import pallas as pl
from jax.experimental.pallas import tpu as pltpu


def _attn_kernel(x_ref, wqkv_ref, wp_ref, bqkv_ref, bp_ref, o_ref, y_scr,
                 *, n_head: int, head_dim: int, seq_len: int, batch_block: int):
    """One grid step == `batch_block` batch elements.

    x_ref    : (Bb, T, C)   f32/bf16  VMEM  (grid-varying)
    wqkv_ref : (C, 3C)      bf16      VMEM  (grid-invariant, single-buffered)
    wp_ref   : (C, C)       bf16      VMEM  (grid-invariant, single-buffered)
    bqkv_ref : (1, 3C)      f32       VMEM  (grid-invariant, single-buffered)
    bp_ref   : (1, C)       f32       VMEM  (grid-invariant, single-buffered)
    o_ref    : (Bb, T, C)   x.dtype   VMEM
    y_scr    : (Bb*T, C)    bf16      VMEM scratch (per-head attention output)
    """
    T = seq_len
    Bb = batch_block
    C = n_head * head_dim
    t = T // 4

    # ---- in-kernel mask: tril(t, t) tiled 4x4, as an additive 0 / -1e30 bias.
    # Kept as (T, T); the leading batch dim broadcasts for free in the add.
    row = jax.lax.broadcasted_iota(jnp.int32, (T, T), 0)
    col = jax.lax.broadcasted_iota(jnp.int32, (T, T), 1)
    bias2 = jnp.where((row % t) >= (col % t), 0.0, -1e30).astype(jnp.float32)

    # ---- fused QKV projection (bf16 operands, f32 accumulation on the MXU) --
    x = x_ref[...].astype(jnp.bfloat16).reshape(Bb * T, C)          # (Bb*T, C)
    scale = 1.0 / math.sqrt(head_dim)

    qkv = jnp.dot(x, wqkv_ref[...],
                  preferred_element_type=jnp.float32) + bqkv_ref[...]  # (Bb*T, 3C) f32
    q = (qkv[:, 0:C] * scale).astype(jnp.bfloat16)   # scale folded into q once
    k = qkv[:, C:2 * C].astype(jnp.bfloat16)
    v = qkv[:, 2 * C:3 * C].astype(jnp.bfloat16)

    # ---- per-head attention, batched over Bb inside the einsums -------------
    # n_head is static and small -> Python loop unrolls.
    for h in range(n_head):
        lo = h * head_dim
        hi = lo + head_dim
        qh = q[:, lo:hi].reshape(Bb, T, head_dim)
        kh = k[:, lo:hi].reshape(Bb, T, head_dim)
        vh = v[:, lo:hi].reshape(Bb, T, head_dim)

        att = jnp.einsum("bqd,bkd->bqk", qh, kh,
                         preferred_element_type=jnp.float32)         # (Bb, T, T) f32
        att = att + bias2[None]                                      # free batch bcast
        att = att - jnp.max(att, axis=-1, keepdims=True)
        p = jnp.exp(att)                                             # f32 softmax math
        denom = jnp.sum(p, axis=-1, keepdims=True)                   # (Bb, T, 1)

        yh = jnp.einsum("bqk,bkd->bqd", p.astype(jnp.bfloat16), vh,
                        preferred_element_type=jnp.float32)          # (Bb, T, hd)
        # Deferred normalization: reciprocal goes to the EUP slot.
        yh = yh * pl.reciprocal(denom, approx=True)

        y_scr[:, lo:hi] = yh.reshape(Bb * T, head_dim).astype(jnp.bfloat16)

    # ---- single full-C output projection (full MXU contraction depth) -------
    out = jnp.dot(y_scr[...], wp_ref[...],
                  preferred_element_type=jnp.float32) + bp_ref[...]  # (Bb*T, C) f32
    o_ref[...] = out.reshape(Bb, T, C).astype(o_ref.dtype)


def _vmem_limit_bytes() -> int:
    """Generation-aware scoped-VMEM limit (v7x has only 64 MiB physical)."""
    cap = 128 * 1024 * 1024
    try:
        cap = int(pltpu.get_tpu_info().vmem_capacity_bytes)
    except Exception:
        pass
    # ~5/8 of physical, capped at 64 MiB: ~40 MiB on v7x, 64 MiB on v5e/v6e.
    return max(32 * 1024 * 1024, min(cap * 5 // 8, 64 * 1024 * 1024))


def _pick_batch_block(B: int, T: int, C: int, vmem_budget: int,
                      max_bb: int = 8) -> int:
    """Largest divisor of B (<= max_bb) whose per-step footprint fits VMEM,
    then capped so the parallel batch axis has >= 2 steps (v7x megacore)."""
    wbytes = 4 * C * C * 2 + 4 * C * 4                 # single-buffered weights + biases

    def step_bytes(bb: int) -> int:
        x_o = 2 * 2 * bb * T * C * 4                   # x and o, double-buffered (f32 worst case)
        qkv_f32 = bb * T * 3 * C * 4                   # fused qkv activation
        qkv_bf16 = 3 * bb * T * C * 2                  # q, k, v bf16 copies
        y = bb * T * C * 2                             # y scratch (bf16)
        att = 2 * bb * T * T * 4                       # att + p for one head (f32)
        return x_o + qkv_f32 + qkv_bf16 + y + att

    budget = int(vmem_budget * 0.8) - wbytes
    bb = 1
    for cand in range(1, min(B, max_bb) + 1):
        if B % cand == 0 and step_bytes(cand) <= budget:
            bb = cand
    # Keep >= 2 grid steps so the "parallel" axis can shard across v7x's two
    # TensorCores (extra ~0.35 us step on 1-TC chips is negligible).
    if B >= 2:
        while B // bb < 2:
            bb = max(d for d in range(1, bb) if B % d == 0)
    return bb


def _build_call(B, T, C, n_head, head_dim, Bb, x_dtype, *, single_buffer_weights):
    kernel = functools.partial(_attn_kernel, n_head=n_head, head_dim=head_dim,
                               seq_len=T, batch_block=Bb)

    def const_spec(shape):
        if single_buffer_weights:
            # Grid-invariant: single-buffering halves their VMEM footprint.
            return pl.BlockSpec(shape, lambda g: (0, 0),
                                pipeline_mode=pl.Buffered(1))
        return pl.BlockSpec(shape, lambda g: (0, 0))

    return pl.pallas_call(
        kernel,
        out_shape=jax.ShapeDtypeStruct((B, T, C), x_dtype),
        grid=(B // Bb,),
        in_specs=[
            pl.BlockSpec((Bb, T, C), lambda g: (g, 0, 0)),   # x
            const_spec((C, 3 * C)),                          # Wqkv (bf16)
            const_spec((C, C)),                              # Wproj (bf16)
            const_spec((1, 3 * C)),                          # bqkv (f32)
            const_spec((1, C)),                              # bproj (f32)
        ],
        out_specs=pl.BlockSpec((Bb, T, C), lambda g: (g, 0, 0)),
        scratch_shapes=[pltpu.VMEM((Bb * T, C), jnp.bfloat16)],
        compiler_params=pltpu.CompilerParams(
            dimension_semantics=("parallel",),
            vmem_limit_bytes=_vmem_limit_bytes()),
    )


def causal_cross_conditional_self_attention(x, params, *, n_head: int):
    """x: (B, T, C) float32 or bfloat16.  params: dict of f32 weights/biases."""
    B, T, C = x.shape
    assert C % n_head == 0
    assert T % 4 == 0
    head_dim = C // n_head
    Bb = _pick_batch_block(B, T, C, _vmem_limit_bytes())

    # Fused QKV weight/bias.  Weights cast to bf16 for the MXU + halved DMA
    # bytes (in a real model they would already live in bf16 in HBM); biases
    # stay f32, shaped (1, ...) for row broadcast.
    wqkv = jnp.concatenate([params["wq"], params["wk"], params["wv"]],
                           axis=1).astype(jnp.bfloat16)              # (C, 3C)
    bqkv = jnp.concatenate([params["bq"], params["bk"], params["bv"]]
                           ).reshape(1, 3 * C).astype(jnp.float32)   # (1, 3C)
    wp = params["wp"].astype(jnp.bfloat16)                           # (C, C)
    bp = params["bp"].reshape(1, C).astype(jnp.float32)              # (1, C)

    args = (x, wqkv, wp, bqkv, bp)
    try:
        return _build_call(B, T, C, n_head, head_dim, Bb, x.dtype,
                           single_buffer_weights=True)(*args)
    except Exception:
        # pl.Buffered(1) unsupported in this JAX build: fall back to the
        # default double-buffered weight pipeline (identical numerics).
        return _build_call(B, T, C, n_head, head_dim, Bb, x.dtype,
                           single_buffer_weights=False)(*args)


def _reference(x, params, *, n_head: int):
    """Pure-JAX f32 reference mirroring the PyTorch forward (eval mode)."""
    B, T, C = x.shape
    hd = C // n_head
    t = T // 4

    def lin(a, w, b):
        return a @ w + b

    q = lin(x, params["wq"], params["bq"]).reshape(B, T, n_head, hd).transpose(0, 2, 1, 3)
    k = lin(x, params["wk"], params["bk"]).reshape(B, T, n_head, hd).transpose(0, 2, 1, 3)
    v = lin(x, params["wv"], params["bv"]).reshape(B, T, n_head, hd).transpose(0, 2, 1, 3)

    att = jnp.einsum("bhtd,bhsd->bhts", q, k) * (1.0 / math.sqrt(hd))
    mask = jnp.tile(jnp.tril(jnp.ones((t, t))), (4, 4))
    att = jnp.where(mask[None, None] > 0, att, -jnp.inf)
    att = jax.nn.softmax(att, axis=-1)
    y = jnp.einsum("bhts,bhsd->bhtd", att, v)
    y = y.transpose(0, 2, 1, 3).reshape(B, T, C)
    return lin(y, params["wp"], params["bp"])


if __name__ == "__main__":
    # Small config consistent with the module: n_embd=32, n_head=4, T=8 (T % 4 == 0)
    B, T, C, n_head = 2, 8, 32, 4

    key = jax.random.PRNGKey(0)
    keys = jax.random.split(key, 9)
    scale = 0.02
    params = {
        "wq": jax.random.normal(keys[0], (C, C), jnp.float32) * scale,
        "wk": jax.random.normal(keys[1], (C, C), jnp.float32) * scale,
        "wv": jax.random.normal(keys[2], (C, C), jnp.float32) * scale,
        "wp": jax.random.normal(keys[3], (C, C), jnp.float32) * scale,
        "bq": jax.random.normal(keys[4], (C,), jnp.float32) * scale,
        "bk": jax.random.normal(keys[5], (C,), jnp.float32) * scale,
        "bv": jax.random.normal(keys[6], (C,), jnp.float32) * scale,
        "bp": jax.random.normal(keys[7], (C,), jnp.float32) * scale,
    }
    x = jax.random.normal(keys[8], (B, T, C), jnp.float32)

    out = causal_cross_conditional_self_attention(x, params, n_head=n_head)
    out = jax.block_until_ready(out)

    ref = _reference(x, params, n_head=n_head)
    assert out.shape == (B, T, C)
    # bf16 matmul operands + approx reciprocal -> compare with bf16-level tolerance.
    assert jnp.allclose(out, ref, atol=5e-3, rtol=5e-2), (
        "mismatch vs reference: max abs err = "
        f"{float(jnp.max(jnp.abs(out - ref)))}")

    print("KERNEL_OK")
</pallas_src>

<mosaic_0001>
module attributes {stable_mosaic.version = 11 : i64} {
  func.func @_attn_kernel(%arg0: i32, %arg1: memref<1x8x32xf32, #tpu.memory_space<vmem>>, %arg2: memref<32x96xbf16, #tpu.memory_space<vmem>>, %arg3: memref<32x32xbf16, #tpu.memory_space<vmem>>, %arg4: memref<1x96xf32, #tpu.memory_space<vmem>>, %arg5: memref<1x32xf32, #tpu.memory_space<vmem>>, %arg6: memref<1x8x32xf32, #tpu.memory_space<vmem>>, %arg7: memref<8x32xbf16, #tpu.memory_space<vmem>>) attributes {dimension_semantics = [#tpu.dimension_semantics<parallel>], iteration_bounds = array<i64: 2>, scalar_prefetch = 0 : i64, scratch_operands = 1 : i64, tpu.core_type = #tpu.core_type<tc>, window_params = [{transform_indices = @transform_0, window_bounds = array<i64: 1, 8, 32>}, {pipeline_mode = #tpu.pipeline_mode<synchronous>, transform_indices = @transform_1, window_bounds = array<i64: 32, 96>}, {pipeline_mode = #tpu.pipeline_mode<synchronous>, transform_indices = @transform_2, window_bounds = array<i64: 32, 32>}, {pipeline_mode = #tpu.pipeline_mode<synchronous>, transform_indices = @transform_3, window_bounds = array<i64: 1, 96>}, {pipeline_mode = #tpu.pipeline_mode<synchronous>, transform_indices = @transform_4, window_bounds = array<i64: 1, 32>}, {transform_indices = @transform_5, window_bounds = array<i64: 1, 8, 32>}]} {
    %0 = tpu.iota {dimensions = array<i32: 0>} : vector<8x8xi32>
    %1 = tpu.iota {dimensions = array<i32: 1>} : vector<8x8xi32>
    %c2_i32 = arith.constant 2 : i32
    %c0_i32 = arith.constant 0 : i32
    %2 = arith.cmpi eq, %c2_i32, %c0_i32 : i32
    %c1_i32 = arith.constant 1 : i32
    %3 = arith.select %2, %c1_i32, %c2_i32 : i32
    %4 = vector.broadcast %3 : i32 to vector<8x8xi32>
    %5 = arith.remsi %0, %4 : vector<8x8xi32>
    %c0_i32_0 = arith.constant 0 : i32
    %6 = vector.broadcast %c0_i32_0 : i32 to vector<8x8xi32>
    %7 = arith.cmpi ne, %5, %6 : vector<8x8xi32>
    %c0_i32_1 = arith.constant 0 : i32
    %8 = vector.broadcast %c0_i32_1 : i32 to vector<8x8xi32>
    %9 = arith.cmpi slt, %5, %8 : vector<8x8xi32>
    %c0_i32_2 = arith.constant 0 : i32
    %10 = arith.cmpi slt, %3, %c0_i32_2 : i32
    %11 = vector.broadcast %10 : i1 to vector<8x8xi1>
    %12 = vector.broadcast %11 : vector<8x8xi1> to vector<8x8xi1>
    %13 = arith.xori %9, %12 : vector<8x8xi1>
    %14 = arith.andi %13, %7 : vector<8x8xi1>
    %15 = vector.broadcast %3 : i32 to vector<8x8xi32>
    %16 = arith.addi %5, %15 : vector<8x8xi32>
    %17 = arith.select %14, %16, %5 : vector<8x8xi1>, vector<8x8xi32>
    %c2_i32_3 = arith.constant 2 : i32
    %c0_i32_4 = arith.constant 0 : i32
    %18 = arith.cmpi eq, %c2_i32_3, %c0_i32_4 : i32
    %c1_i32_5 = arith.constant 1 : i32
    %19 = arith.select %18, %c1_i32_5, %c2_i32_3 : i32
    %20 = vector.broadcast %19 : i32 to vector<8x8xi32>
    %21 = arith.remsi %1, %20 : vector<8x8xi32>
    %c0_i32_6 = arith.constant 0 : i32
    %22 = vector.broadcast %c0_i32_6 : i32 to vector<8x8xi32>
    %23 = arith.cmpi ne, %21, %22 : vector<8x8xi32>
    %c0_i32_7 = arith.constant 0 : i32
    %24 = vector.broadcast %c0_i32_7 : i32 to vector<8x8xi32>
    %25 = arith.cmpi slt, %21, %24 : vector<8x8xi32>
    %c0_i32_8 = arith.constant 0 : i32
    %26 = arith.cmpi slt, %19, %c0_i32_8 : i32
    %27 = vector.broadcast %26 : i1 to vector<8x8xi1>
    %28 = vector.broadcast %27 : vector<8x8xi1> to vector<8x8xi1>
    %29 = arith.xori %25, %28 : vector<8x8xi1>
    %30 = arith.andi %29, %23 : vector<8x8xi1>
    %31 = vector.broadcast %19 : i32 to vector<8x8xi32>
    %32 = arith.addi %21, %31 : vector<8x8xi32>
    %33 = arith.select %30, %32, %21 : vector<8x8xi1>, vector<8x8xi32>
    %34 = arith.cmpi sge, %17, %33 : vector<8x8xi32>
    %cst = arith.constant 0.000000e+00 : f32
    %cst_9 = arith.constant -1.000000e+30 : f32
    %35 = vector.broadcast %cst : f32 to vector<8x8xf32>
    %36 = vector.broadcast %cst_9 : f32 to vector<8x8xf32>
    %37 = arith.select %34, %35, %36 : vector<8x8xi1>, vector<8x8xf32>
    %c0 = arith.constant 0 : index
    %c0_10 = arith.constant 0 : index
    %c0_11 = arith.constant 0 : index
    %38 = vector.load %arg1[%c0, %c0_10, %c0_11] : memref<1x8x32xf32, #tpu.memory_space<vmem>>, vector<1x8x32xf32>
    %39 = arith.truncf %38 : vector<1x8x32xf32> to vector<1x8x32xbf16>
    %40 = vector.shape_cast %39 : vector<1x8x32xbf16> to vector<8x32xbf16>
    %c0_12 = arith.constant 0 : index
    %c0_13 = arith.constant 0 : index
    %41 = vector.load %arg2[%c0_12, %c0_13] : memref<32x96xbf16, #tpu.memory_space<vmem>>, vector<32x96xbf16>
    %cst_14 = arith.constant dense<0.000000e+00> : vector<8x96xf32>
    %42 = tpu.matmul %40, %41, %cst_14 {dimension_numbers = #tpu.dot_dimension_numbers<[1], [0], [0], [1], [0, 0, 1, 1], [], []>} : vector<8x32xbf16>, vector<32x96xbf16>, vector<8x96xf32> -> vector<8x96xf32>
    %c0_15 = arith.constant 0 : index
    %c0_16 = arith.constant 0 : index
    %43 = vector.load %arg4[%c0_15, %c0_16] : memref<1x96xf32, #tpu.memory_space<vmem>>, vector<1x96xf32>
    %44 = vector.broadcast %43 : vector<1x96xf32> to vector<8x96xf32>
    %45 = arith.addf %42, %44 : vector<8x96xf32>
    %46 = vector.extract_strided_slice %45 {offsets = [0, 0], sizes = [8, 32], strides = [1, 1]} : vector<8x96xf32> to vector<8x32xf32>
    %cst_17 = arith.constant 0.353553385 : f32
    %47 = vector.broadcast %cst_17 : f32 to vector<8x32xf32>
    %48 = arith.mulf %46, %47 : vector<8x32xf32>
    %49 = arith.truncf %48 : vector<8x32xf32> to vector<8x32xbf16>
    %50 = vector.extract_strided_slice %45 {offsets = [0, 32], sizes = [8, 32], strides = [1, 1]} : vector<8x96xf32> to vector<8x32xf32>
    %51 = arith.truncf %50 : vector<8x32xf32> to vector<8x32xbf16>
    %52 = vector.extract_strided_slice %45 {offsets = [0, 64], sizes = [8, 32], strides = [1, 1]} : vector<8x96xf32> to vector<8x32xf32>
    %53 = arith.truncf %52 : vector<8x32xf32> to vector<8x32xbf16>
    %54 = vector.extract_strided_slice %49 {offsets = [0, 0], sizes = [8, 8], strides = [1, 1]} : vector<8x32xbf16> to vector<8x8xbf16>
    %55 = vector.shape_cast %54 : vector<8x8xbf16> to vector<1x8x8xbf16>
    %56 = vector.extract_strided_slice %51 {offsets = [0, 0], sizes = [8, 8], strides = [1, 1]} : vector<8x32xbf16> to vector<8x8xbf16>
    %57 = vector.shape_cast %56 : vector<8x8xbf16> to vector<1x8x8xbf16>
    %58 = vector.extract_strided_slice %53 {offsets = [0, 0], sizes = [8, 8], strides = [1, 1]} : vector<8x32xbf16> to vector<8x8xbf16>
    %59 = vector.shape_cast %58 : vector<8x8xbf16> to vector<1x8x8xbf16>
    "tpu.trace_start"() <{level = 10 : i32, message = "bqd,bkd->bqk"}> : () -> ()
    %cst_18 = arith.constant dense<0.000000e+00> : vector<1x8x8xf32>
    %60 = tpu.matmul %55, %57, %cst_18 {dimension_numbers = #tpu.dot_dimension_numbers<[2], [2], [1], [1], [0, 0, 0, 1, 1, 1], [0], [0]>} : vector<1x8x8xbf16>, vector<1x8x8xbf16>, vector<1x8x8xf32> -> vector<1x8x8xf32>
    "tpu.trace_stop"() : () -> ()
    %61 = vector.shape_cast %37 : vector<8x8xf32> to vector<1x8x8xf32>
    %62 = arith.addf %60, %61 : vector<1x8x8xf32>
    %cst_19 = arith.constant dense<0xFF800000> : vector<1x8xf32>
    %63 = vector.multi_reduction <maximumf>, %62, %cst_19 [2] : vector<1x8x8xf32> to vector<1x8xf32>
    %64 = vector.shape_cast %63 : vector<1x8xf32> to vector<1x8x1xf32>
    %65 = vector.broadcast %64 : vector<1x8x1xf32> to vector<1x8x8xf32>
    %66 = arith.subf %62, %65 : vector<1x8x8xf32>
    %67 = math.exp %66 : vector<1x8x8xf32>
    %cst_20 = arith.constant dense<0.000000e+00> : vector<1x8xf32>
    %68 = vector.multi_reduction <add>, %67, %cst_20 [2] : vector<1x8x8xf32> to vector<1x8xf32>
    %69 = vector.shape_cast %68 : vector<1x8xf32> to vector<1x8x1xf32>
    %70 = arith.truncf %67 : vector<1x8x8xf32> to vector<1x8x8xbf16>
    "tpu.trace_start"() <{level = 10 : i32, message = "bqk,bkd->bqd"}> : () -> ()
    %cst_21 = arith.constant dense<0.000000e+00> : vector<1x8x8xf32>
    %71 = tpu.matmul %70, %59, %cst_21 {dimension_numbers = #tpu.dot_dimension_numbers<[2], [1], [1], [2], [0, 0, 0, 1, 1, 2], [0], [0]>} : vector<1x8x8xbf16>, vector<1x8x8xbf16>, vector<1x8x8xf32> -> vector<1x8x8xf32>
    "tpu.trace_stop"() : () -> ()
    %72 = tpu.reciprocal %69 {approx = true} : vector<1x8x1xf32> -> vector<1x8x1xf32>
    %73 = vector.broadcast %72 : vector<1x8x1xf32> to vector<1x8x8xf32>
    %74 = arith.mulf %71, %73 : vector<1x8x8xf32>
    %75 = vector.shape_cast %74 : vector<1x8x8xf32> to vector<8x8xf32>
    %76 = arith.truncf %75 : vector<8x8xf32> to vector<8x8xbf16>
    %c0_22 = arith.constant 0 : index
    %c0_23 = arith.constant 0 : index
    %77 = vector.load %arg7[%c0_22, %c0_23] : memref<8x32xbf16, #tpu.memory_space<vmem>>, vector<8x8xbf16>
    tpu.vector_store %arg7[%c0_22, %c0_23], %76 {strides = array<i32>} : memref<8x32xbf16, #tpu.memory_space<vmem>>, vector<8x8xbf16>,
    %78 = vector.extract_strided_slice %49 {offsets = [0, 8], sizes = [8, 8], strides = [1, 1]} : vector<8x32xbf16> to vector<8x8xbf16>
    %79 = vector.shape_cast %78 : vector<8x8xbf16> to vector<1x8x8xbf16>
    %80 = vector.extract_strided_slice %51 {offsets = [0, 8], sizes = [8, 8], strides = [1, 1]} : vector<8x32xbf16> to vector<8x8xbf16>
    %81 = vector.shape_cast %80 : vector<8x8xbf16> to vector<1x8x8xbf16>
    %82 = vector.extract_strided_slice %53 {offsets = [0, 8], sizes = [8, 8], strides = [1, 1]} : vector<8x32xbf16> to vector<8x8xbf16>
    %83 = vector.shape_cast %82 : vector<8x8xbf16> to vector<1x8x8xbf16>
    "tpu.trace_start"() <{level = 10 : i32, message = "bqd,bkd->bqk"}> : () -> ()
    %cst_24 = arith.constant dense<0.000000e+00> : vector<1x8x8xf32>
    %84 = tpu.matmul %79, %81, %cst_24 {dimension_numbers = #tpu.dot_dimension_numbers<[2], [2], [1], [1], [0, 0, 0, 1, 1, 1], [0], [0]>} : vector<1x8x8xbf16>, vector<1x8x8xbf16>, vector<1x8x8xf32> -> vector<1x8x8xf32>
    "tpu.trace_stop"() : () -> ()
    %85 = vector.shape_cast %37 : vector<8x8xf32> to vector<1x8x8xf32>
    %86 = arith.addf %84, %85 : vector<1x8x8xf32>
    %cst_25 = arith.constant dense<0xFF800000> : vector<1x8xf32>
    %87 = vector.multi_reduction <maximumf>, %86, %cst_25 [2] : vector<1x8x8xf32> to vector<1x8xf32>
    %88 = vector.shape_cast %87 : vector<1x8xf32> to vector<1x8x1xf32>
    %89 = vector.broadcast %88 : vector<1x8x1xf32> to vector<1x8x8xf32>
    %90 = arith.subf %86, %89 : vector<1x8x8xf32>
    %91 = math.exp %90 : vector<1x8x8xf32>
    %cst_26 = arith.constant dense<0.000000e+00> : vector<1x8xf32>
    %92 = vector.multi_reduction <add>, %91, %cst_26 [2] : vector<1x8x8xf32> to vector<1x8xf32>
    %93 = vector.shape_cast %92 : vector<1x8xf32> to vector<1x8x1xf32>
    %94 = arith.truncf %91 : vector<1x8x8xf32> to vector<1x8x8xbf16>
    "tpu.trace_start"() <{level = 10 : i32, message = "bqk,bkd->bqd"}> : () -> ()
    %cst_27 = arith.constant dense<0.000000e+00> : vector<1x8x8xf32>
    %95 = tpu.matmul %94, %83, %cst_27 {dimension_numbers = #tpu.dot_dimension_numbers<[2], [1], [1], [2], [0, 0, 0, 1, 1, 2], [0], [0]>} : vector<1x8x8xbf16>, vector<1x8x8xbf16>, vector<1x8x8xf32> -> vector<1x8x8xf32>
    "tpu.trace_stop"() : () -> ()
    %96 = tpu.reciprocal %93 {approx = true} : vector<1x8x1xf32> -> vector<1x8x1xf32>
    %97 = vector.broadcast %96 : vector<1x8x1xf32> to vector<1x8x8xf32>
    %98 = arith.mulf %95, %97 : vector<1x8x8xf32>
    %99 = vector.shape_cast %98 : vector<1x8x8xf32> to vector<8x8xf32>
    %100 = arith.truncf %99 : vector<8x8xf32> to vector<8x8xbf16>
    %c0_28 = arith.constant 0 : index
    %c8 = arith.constant 8 : index
    %101 = vector.load %arg7[%c0_28, %c8] : memref<8x32xbf16, #tpu.memory_space<vmem>>, vector<8x8xbf16>
    tpu.vector_store %arg7[%c0_28, %c8], %100 {strides = array<i32>} : memref<8x32xbf16, #tpu.memory_space<vmem>>, vector<8x8xbf16>,
    %102 = vector.extract_strided_slice %49 {offsets = [0, 16], sizes = [8, 8], strides = [1, 1]} : vector<8x32xbf16> to vector<8x8xbf16>
    %103 = vector.shape_cast %102 : vector<8x8xbf16> to vector<1x8x8xbf16>
    %104 = vector.extract_strided_slice %51 {offsets = [0, 16], sizes = [8, 8], strides = [1, 1]} : vector<8x32xbf16> to vector<8x8xbf16>
    %105 = vector.shape_cast %104 : vector<8x8xbf16> to vector<1x8x8xbf16>
    %106 = vector.extract_strided_slice %53 {offsets = [0, 16], sizes = [8, 8], strides = [1, 1]} : vector<8x32xbf16> to vector<8x8xbf16>
    %107 = vector.shape_cast %106 : vector<8x8xbf16> to vector<1x8x8xbf16>
    "tpu.trace_start"() <{level = 10 : i32, message = "bqd,bkd->bqk"}> : () -> ()
    %cst_29 = arith.constant dense<0.000000e+00> : vector<1x8x8xf32>
    %108 = tpu.matmul %103, %105, %cst_29 {dimension_numbers = #tpu.dot_dimension_numbers<[2], [2], [1], [1], [0, 0, 0, 1, 1, 1], [0], [0]>} : vector<1x8x8xbf16>, vector<1x8x8xbf16>, vector<1x8x8xf32> -> vector<1x8x8xf32>
    "tpu.trace_stop"() : () -> ()
    %109 = vector.shape_cast %37 : vector<8x8xf32> to vector<1x8x8xf32>
    %110 = arith.addf %108, %109 : vector<1x8x8xf32>
    %cst_30 = arith.constant dense<0xFF800000> : vector<1x8xf32>
    %111 = vector.multi_reduction <maximumf>, %110, %cst_30 [2] : vector<1x8x8xf32> to vector<1x8xf32>
    %112 = vector.shape_cast %111 : vector<1x8xf32> to vector<1x8x1xf32>
    %113 = vector.broadcast %112 : vector<1x8x1xf32> to vector<1x8x8xf32>
    %114 = arith.subf %110, %113 : vector<1x8x8xf32>
    %115 = math.exp %114 : vector<1x8x8xf32>
    %cst_31 = arith.constant dense<0.000000e+00> : vector<1x8xf32>
    %116 = vector.multi_reduction <add>, %115, %cst_31 [2] : vector<1x8x8xf32> to vector<1x8xf32>
    %117 = vector.shape_cast %116 : vector<1x8xf32> to vector<1x8x1xf32>
    %118 = arith.truncf %115 : vector<1x8x8xf32> to vector<1x8x8xbf16>
    "tpu.trace_start"() <{level = 10 : i32, message = "bqk,bkd->bqd"}> : () -> ()
    %cst_32 = arith.constant dense<0.000000e+00> : vector<1x8x8xf32>
    %119 = tpu.matmul %118, %107, %cst_32 {dimension_numbers = #tpu.dot_dimension_numbers<[2], [1], [1], [2], [0, 0, 0, 1, 1, 2], [0], [0]>} : vector<1x8x8xbf16>, vector<1x8x8xbf16>, vector<1x8x8xf32> -> vector<1x8x8xf32>
    "tpu.trace_stop"() : () -> ()
    %120 = tpu.reciprocal %117 {approx = true} : vector<1x8x1xf32> -> vector<1x8x1xf32>
    %121 = vector.broadcast %120 : vector<1x8x1xf32> to vector<1x8x8xf32>
    %122 = arith.mulf %119, %121 : vector<1x8x8xf32>
    %123 = vector.shape_cast %122 : vector<1x8x8xf32> to vector<8x8xf32>
    %124 = arith.truncf %123 : vector<8x8xf32> to vector<8x8xbf16>
    %c0_33 = arith.constant 0 : index
    %c16 = arith.constant 16 : index
    %125 = vector.load %arg7[%c0_33, %c16] : memref<8x32xbf16, #tpu.memory_space<vmem>>, vector<8x8xbf16>
    tpu.vector_store %arg7[%c0_33, %c16], %124 {strides = array<i32>} : memref<8x32xbf16, #tpu.memory_space<vmem>>, vector<8x8xbf16>,
    %126 = vector.extract_strided_slice %49 {offsets = [0, 24], sizes = [8, 8], strides = [1, 1]} : vector<8x32xbf16> to vector<8x8xbf16>
    %127 = vector.shape_cast %126 : vector<8x8xbf16> to vector<1x8x8xbf16>
    %128 = vector.extract_strided_slice %51 {offsets = [0, 24], sizes = [8, 8], strides = [1, 1]} : vector<8x32xbf16> to vector<8x8xbf16>
    %129 = vector.shape_cast %128 : vector<8x8xbf16> to vector<1x8x8xbf16>
    %130 = vector.extract_strided_slice %53 {offsets = [0, 24], sizes = [8, 8], strides = [1, 1]} : vector<8x32xbf16> to vector<8x8xbf16>
    %131 = vector.shape_cast %130 : vector<8x8xbf16> to vector<1x8x8xbf16>
    "tpu.trace_start"() <{level = 10 : i32, message = "bqd,bkd->bqk"}> : () -> ()
    %cst_34 = arith.constant dense<0.000000e+00> : vector<1x8x8xf32>
    %132 = tpu.matmul %127, %129, %cst_34 {dimension_numbers = #tpu.dot_dimension_numbers<[2], [2], [1], [1], [0, 0, 0, 1, 1, 1], [0], [0]>} : vector<1x8x8xbf16>, vector<1x8x8xbf16>, vector<1x8x8xf32> -> vector<1x8x8xf32>
    "tpu.trace_stop"() : () -> ()
    %133 = vector.shape_cast %37 : vector<8x8xf32> to vector<1x8x8xf32>
    %134 = arith.addf %132, %133 : vector<1x8x8xf32>
    %cst_35 = arith.constant dense<0xFF800000> : vector<1x8xf32>
    %135 = vector.multi_reduction <maximumf>, %134, %cst_35 [2] : vector<1x8x8xf32> to vector<1x8xf32>
    %136 = vector.shape_cast %135 : vector<1x8xf32> to vector<1x8x1xf32>
    %137 = vector.broadcast %136 : vector<1x8x1xf32> to vector<1x8x8xf32>
    %138 = arith.subf %134, %137 : vector<1x8x8xf32>
    %139 = math.exp %138 : vector<1x8x8xf32>
    %cst_36 = arith.constant dense<0.000000e+00> : vector<1x8xf32>
    %140 = vector.multi_reduction <add>, %139, %cst_36 [2] : vector<1x8x8xf32> to vector<1x8xf32>
    %141 = vector.shape_cast %140 : vector<1x8xf32> to vector<1x8x1xf32>
    %142 = arith.truncf %139 : vector<1x8x8xf32> to vector<1x8x8xbf16>
    "tpu.trace_start"() <{level = 10 : i32, message = "bqk,bkd->bqd"}> : () -> ()
    %cst_37 = arith.constant dense<0.000000e+00> : vector<1x8x8xf32>
    %143 = tpu.matmul %142, %131, %cst_37 {dimension_numbers = #tpu.dot_dimension_numbers<[2], [1], [1], [2], [0, 0, 0, 1, 1, 2], [0], [0]>} : vector<1x8x8xbf16>, vector<1x8x8xbf16>, vector<1x8x8xf32> -> vector<1x8x8xf32>
    "tpu.trace_stop"() : () -> ()
    %144 = tpu.reciprocal %141 {approx = true} : vector<1x8x1xf32> -> vector<1x8x1xf32>
    %145 = vector.broadcast %144 : vector<1x8x1xf32> to vector<1x8x8xf32>
    %146 = arith.mulf %143, %145 : vector<1x8x8xf32>
    %147 = vector.shape_cast %146 : vector<1x8x8xf32> to vector<8x8xf32>
    %148 = arith.truncf %147 : vector<8x8xf32> to vector<8x8xbf16>
    %c0_38 = arith.constant 0 : index
    %c24 = arith.constant 24 : index
    %149 = vector.load %arg7[%c0_38, %c24] : memref<8x32xbf16, #tpu.memory_space<vmem>>, vector<8x8xbf16>
    tpu.vector_store %arg7[%c0_38, %c24], %148 {strides = array<i32>} : memref<8x32xbf16, #tpu.memory_space<vmem>>, vector<8x8xbf16>,
    %c0_39 = arith.constant 0 : index
    %c0_40 = arith.constant 0 : index
    %150 = vector.load %arg7[%c0_39, %c0_40] : memref<8x32xbf16, #tpu.memory_space<vmem>>, vector<8x32xbf16>
    %c0_41 = arith.constant 0 : index
    %c0_42 = arith.constant 0 : index
    %151 = vector.load %arg3[%c0_41, %c0_42] : memref<32x32xbf16, #tpu.memory_space<vmem>>, vector<32x32xbf16>
    %cst_43 = arith.constant dense<0.000000e+00> : vector<8x32xf32>
    %152 = tpu.matmul %150, %151, %cst_43 {dimension_numbers = #tpu.dot_dimension_numbers<[1], [0], [0], [1], [0, 0, 1, 1], [], []>} : vector<8x32xbf16>, vector<32x32xbf16>, vector<8x32xf32> -> vector<8x32xf32>
    %c0_44 = arith.constant 0 : index
    %c0_45 = arith.constant 0 : index
    %153 = vector.load %arg5[%c0_44, %c0_45] : memref<1x32xf32, #tpu.memory_space<vmem>>, vector<1x32xf32>
    %154 = vector.broadcast %153 : vector<1x32xf32> to vector<8x32xf32>
    %155 = arith.addf %152, %154 : vector<8x32xf32>
    %156 = vector.shape_cast %155 : vector<8x32xf32> to vector<1x8x32xf32>
    %c0_46 = arith.constant 0 : index
    %c0_47 = arith.constant 0 : index
    %c0_48 = arith.constant 0 : index
    %157 = vector.load %arg6[%c0_46, %c0_47, %c0_48] : memref<1x8x32xf32, #tpu.memory_space<vmem>>, vector<1x8x32xf32>
    tpu.vector_store %arg6[%c0_46, %c0_47, %c0_48], %156 {strides = array<i32>} : memref<1x8x32xf32, #tpu.memory_space<vmem>>, vector<1x8x32xf32>,
    return
  }
  func.func @transform_0(%arg0: i32) -> (i32, i32, i32) {
    %c0_i32 = arith.constant 0 : i32
    %c0_i32_0 = arith.constant 0 : i32
    %c0_i32_1 = arith.constant 0 : i32
    return %arg0, %c0_i32, %c0_i32_0 : i32, i32, i32
  }
  func.func @transform_1(%arg0: i32) -> (i32, i32) {
    %c0_i32 = arith.constant 0 : i32
    %c0_i32_0 = arith.constant 0 : i32
    %c0_i32_1 = arith.constant 0 : i32
    return %c0_i32, %c0_i32_0 : i32, i32
  }
  func.func @transform_2(%arg0: i32) -> (i32, i32) {
    %c0_i32 = arith.constant 0 : i32
    %c0_i32_0 = arith.constant 0 : i32
    %c0_i32_1 = arith.constant 0 : i32
    return %c0_i32, %c0_i32_0 : i32, i32
  }
  func.func @transform_3(%arg0: i32) -> (i32, i32) {
    %c0_i32 = arith.constant 0 : i32
    %c0_i32_0 = arith.constant 0 : i32
    %c0_i32_1 = arith.constant 0 : i32
    return %c0_i32, %c0_i32_0 : i32, i32
  }
  func.func @transform_4(%arg0: i32) -> (i32, i32) {
    %c0_i32 = arith.constant 0 : i32
    %c0_i32_0 = arith.constant 0 : i32
    %c0_i32_1 = arith.constant 0 : i32
    return %c0_i32, %c0_i32_0 : i32, i32
  }
  func.func @transform_5(%arg0: i32) -> (i32, i32, i32) {
    %c0_i32 = arith.constant 0 : i32
    %c0_i32_0 = arith.constant 0 : i32
    %c0_i32_1 = arith.constant 0 : i32
    return %arg0, %c0_i32, %c0_i32_0 : i32, i32, i32
  }
}

module attributes {stable_mosaic.version = 11 : i64} {
  func.func @_attn_kernel(%arg0: i32, %arg1: memref<1x8x32xf32, #tpu.memory_space<vmem>>, %arg2: memref<32x96xbf16, #tpu.memory_space<vmem>>, %arg3: memref<32x32xbf16, #tpu.memory_space<vmem>>, %arg4: memref<1x96xf32, #tpu.memory_space<vmem>>, %arg5: memref<1x32xf32, #tpu.memory_space<vmem>>, %arg6: memref<1x8x32xf32, #tpu.memory_space<vmem>>, %arg7: memref<8x32xbf16, #tpu.memory_space<vmem>>) attributes {dimension_semantics = [#tpu.dimension_semantics<parallel>], iteration_bounds = array<i64: 2>, scalar_prefetch = 0 : i64, scratch_operands = 1 : i64, tpu.core_type = #tpu.core_type<tc>, window_params = [{transform_indices = @transform_0, window_bounds = array<i64: 1, 8, 32>}, {pipeline_mode = #tpu.pipeline_mode<synchronous>, transform_indices = @transform_1, window_bounds = array<i64: 32, 96>}, {pipeline_mode = #tpu.pipeline_mode<synchronous>, transform_indices = @transform_2, window_bounds = array<i64: 32, 32>}, {pipeline_mode = #tpu.pipeline_mode<synchronous>, transform_indices = @transform_3, window_bounds = array<i64: 1, 96>}, {pipeline_mode = #tpu.pipeline_mode<synchronous>, transform_indices = @transform_4, window_bounds = array<i64: 1, 32>}, {transform_indices = @transform_5, window_bounds = array<i64: 1, 8, 32>}]} {
    %0 = tpu.iota {dimensions = array<i32: 0>} : vector<8x8xi32>
    %1 = tpu.iota {dimensions = array<i32: 1>} : vector<8x8xi32>
    %c2_i32 = arith.constant 2 : i32
    %c0_i32 = arith.constant 0 : i32
    %2 = arith.cmpi eq, %c2_i32, %c0_i32 : i32
    %c1_i32 = arith.constant 1 : i32
    %3 = arith.select %2, %c1_i32, %c2_i32 : i32
    %4 = vector.broadcast %3 : i32 to vector<8x8xi32>
    %5 = arith.remsi %0, %4 : vector<8x8xi32>
    %c0_i32_0 = arith.constant 0 : i32
    %6 = vector.broadcast %c0_i32_0 : i32 to vector<8x8xi32>
    %7 = arith.cmpi ne, %5, %6 : vector<8x8xi32>
    %c0_i32_1 = arith.constant 0 : i32
    %8 = vector.broadcast %c0_i32_1 : i32 to vector<8x8xi32>
    %9 = arith.cmpi slt, %5, %8 : vector<8x8xi32>
    %c0_i32_2 = arith.constant 0 : i32
    %10 = arith.cmpi slt, %3, %c0_i32_2 : i32
    %11 = vector.broadcast %10 : i1 to vector<8x8xi1>
    %12 = vector.broadcast %11 : vector<8x8xi1> to vector<8x8xi1>
    %13 = arith.xori %9, %12 : vector<8x8xi1>
    %14 = arith.andi %13, %7 : vector<8x8xi1>
    %15 = vector.broadcast %3 : i32 to vector<8x8xi32>
    %16 = arith.addi %5, %15 : vector<8x8xi32>
    %17 = arith.select %14, %16, %5 : vector<8x8xi1>, vector<8x8xi32>
    %c2_i32_3 = arith.constant 2 : i32
    %c0_i32_4 = arith.constant 0 : i32
    %18 = arith.cmpi eq, %c2_i32_3, %c0_i32_4 : i32
    %c1_i32_5 = arith.constant 1 : i32
    %19 = arith.select %18, %c1_i32_5, %c2_i32_3 : i32
    %20 = vector.broadcast %19 : i32 to vector<8x8xi32>
    %21 = arith.remsi %1, %20 : vector<8x8xi32>
    %c0_i32_6 = arith.constant 0 : i32
    %22 = vector.broadcast %c0_i32_6 : i32 to vector<8x8xi32>
    %23 = arith.cmpi ne, %21, %22 : vector<8x8xi32>
    %c0_i32_7 = arith.constant 0 : i32
    %24 = vector.broadcast %c0_i32_7 : i32 to vector<8x8xi32>
    %25 = arith.cmpi slt, %21, %24 : vector<8x8xi32>
    %c0_i32_8 = arith.constant 0 : i32
    %26 = arith.cmpi slt, %19, %c0_i32_8 : i32
    %27 = vector.broadcast %26 : i1 to vector<8x8xi1>
    %28 = vector.broadcast %27 : vector<8x8xi1> to vector<8x8xi1>
    %29 = arith.xori %25, %28 : vector<8x8xi1>
    %30 = arith.andi %29, %23 : vector<8x8xi1>
    %31 = vector.broadcast %19 : i32 to vector<8x8xi32>
    %32 = arith.addi %21, %31 : vector<8x8xi32>
    %33 = arith.select %30, %32, %21 : vector<8x8xi1>, vector<8x8xi32>
    %34 = arith.cmpi sge, %17, %33 : vector<8x8xi32>
    %cst = arith.constant 0.000000e+00 : f32
    %cst_9 = arith.constant -1.000000e+30 : f32
    %35 = vector.broadcast %cst : f32 to vector<8x8xf32>
    %36 = vector.broadcast %cst_9 : f32 to vector<8x8xf32>
    %37 = arith.select %34, %35, %36 : vector<8x8xi1>, vector<8x8xf32>
    %c0 = arith.constant 0 : index
    %c0_10 = arith.constant 0 : index
    %c0_11 = arith.constant 0 : index
    %38 = vector.load %arg1[%c0, %c0_10, %c0_11] : memref<1x8x32xf32, #tpu.memory_space<vmem>>, vector<1x8x32xf32>
    %39 = arith.truncf %38 : vector<1x8x32xf32> to vector<1x8x32xbf16>
    %40 = vector.shape_cast %39 : vector<1x8x32xbf16> to vector<8x32xbf16>
    %c0_12 = arith.constant 0 : index
    %c0_13 = arith.constant 0 : index
    %41 = vector.load %arg2[%c0_12, %c0_13] : memref<32x96xbf16, #tpu.memory_space<vmem>>, vector<32x96xbf16>
    %cst_14 = arith.constant dense<0.000000e+00> : vector<8x96xf32>
    %42 = tpu.matmul %40, %41, %cst_14 {dimension_numbers = #tpu.dot_dimension_numbers<[1], [0], [0], [1], [0, 0, 1, 1], [], []>} : vector<8x32xbf16>, vector<32x96xbf16>, vector<8x96xf32> -> vector<8x96xf32>
    %c0_15 = arith.constant 0 : index
    %c0_16 = arith.constant 0 : index
    %43 = vector.load %arg4[%c0_15, %c0_16] : memref<1x96xf32, #tpu.memory_space<vmem>>, vector<1x96xf32>
    %44 = vector.broadcast %43 : vector<1x96xf32> to vector<8x96xf32>
    %45 = arith.addf %42, %44 : vector<8x96xf32>
    %46 = vector.extract_strided_slice %45 {offsets = [0, 0], sizes = [8, 32], strides = [1, 1]} : vector<8x96xf32> to vector<8x32xf32>
    %cst_17 = arith.constant 0.353553385 : f32
    %47 = vector.broadcast %cst_17 : f32 to vector<8x32xf32>
    %48 = arith.mulf %46, %47 : vector<8x32xf32>
    %49 = arith.truncf %48 : vector<8x32xf32> to vector<8x32xbf16>
    %50 = vector.extract_strided_slice %45 {offsets = [0, 32], sizes = [8, 32], strides = [1, 1]} : vector<8x96xf32> to vector<8x32xf32>
    %51 = arith.truncf %50 : vector<8x32xf32> to vector<8x32xbf16>
    %52 = vector.extract_strided_slice %45 {offsets = [0, 64], sizes = [8, 32], strides = [1, 1]} : vector<8x96xf32> to vector<8x32xf32>
    %53 = arith.truncf %52 : vector<8x32xf32> to vector<8x32xbf16>
    %54 = vector.extract_strided_slice %49 {offsets = [0, 0], sizes = [8, 8], strides = [1, 1]} : vector<8x32xbf16> to vector<8x8xbf16>
    %55 = vector.shape_cast %54 : vector<8x8xbf16> to vector<1x8x8xbf16>
    %56 = vector.extract_strided_slice %51 {offsets = [0, 0], sizes = [8, 8], strides = [1, 1]} : vector<8x32xbf16> to vector<8x8xbf16>
    %57 = vector.shape_cast %56 : vector<8x8xbf16> to vector<1x8x8xbf16>
    %58 = vector.extract_strided_slice %53 {offsets = [0, 0], sizes = [8, 8], strides = [1, 1]} : vector<8x32xbf16> to vector<8x8xbf16>
    %59 = vector.shape_cast %58 : vector<8x8xbf16> to vector<1x8x8xbf16>
    "tpu.trace_start"() <{level = 10 : i32, message = "bqd,bkd->bqk"}> : () -> ()
    %cst_18 = arith.constant dense<0.000000e+00> : vector<1x8x8xf32>
    %60 = tpu.matmul %55, %57, %cst_18 {dimension_numbers = #tpu.dot_dimension_numbers<[2], [2], [1], [1], [0, 0, 0, 1, 1, 1], [0], [0]>} : vector<1x8x8xbf16>, vector<1x8x8xbf16>, vector<1x8x8xf32> -> vector<1x8x8xf32>
    "tpu.trace_stop"() : () -> ()
    %61 = vector.shape_cast %37 : vector<8x8xf32> to vector<1x8x8xf32>
    %62 = arith.addf %60, %61 : vector<1x8x8xf32>
    %cst_19 = arith.constant dense<0xFF800000> : vector<1x8xf32>
    %63 = vector.multi_reduction <maximumf>, %62, %cst_19 [2] : vector<1x8x8xf32> to vector<1x8xf32>
    %64 = vector.shape_cast %63 : vector<1x8xf32> to vector<1x8x1xf32>
    %65 = vector.broadcast %64 : vector<1x8x1xf32> to vector<1x8x8xf32>
    %66 = arith.subf %62, %65 : vector<1x8x8xf32>
    %67 = math.exp %66 : vector<1x8x8xf32>
    %cst_20 = arith.constant dense<0.000000e+00> : vector<1x8xf32>
    %68 = vector.multi_reduction <add>, %67, %cst_20 [2] : vector<1x8x8xf32> to vector<1x8xf32>
    %69 = vector.shape_cast %68 : vector<1x8xf32> to vector<1x8x1xf32>
    %70 = arith.truncf %67 : vector<1x8x8xf32> to vector<1x8x8xbf16>
    "tpu.trace_start"() <{level = 10 : i32, message = "bqk,bkd->bqd"}> : () -> ()
    %cst_21 = arith.constant dense<0.000000e+00> : vector<1x8x8xf32>
    %71 = tpu.matmul %70, %59, %cst_21 {dimension_numbers = #tpu.dot_dimension_numbers<[2], [1], [1], [2], [0, 0, 0, 1, 1, 2], [0], [0]>} : vector<1x8x8xbf16>, vector<1x8x8xbf16>, vector<1x8x8xf32> -> vector<1x8x8xf32>
    "tpu.trace_stop"() : () -> ()
    %72 = tpu.reciprocal %69 {approx = true} : vector<1x8x1xf32> -> vector<1x8x1xf32>
    %73 = vector.broadcast %72 : vector<1x8x1xf32> to vector<1x8x8xf32>
    %74 = arith.mulf %71, %73 : vector<1x8x8xf32>
    %75 = vector.shape_cast %74 : vector<1x8x8xf32> to vector<8x8xf32>
    %76 = arith.truncf %75 : vector<8x8xf32> to vector<8x8xbf16>
    %c0_22 = arith.constant 0 : index
    %c0_23 = arith.constant 0 : index
    %77 = vector.load %arg7[%c0_22, %c0_23] : memref<8x32xbf16, #tpu.memory_space<vmem>>, vector<8x8xbf16>
    tpu.vector_store %arg7[%c0_22, %c0_23], %76 {strides = array<i32>} : memref<8x32xbf16, #tpu.memory_space<vmem>>, vector<8x8xbf16>,
    %78 = vector.extract_strided_slice %49 {offsets = [0, 8], sizes = [8, 8], strides = [1, 1]} : vector<8x32xbf16> to vector<8x8xbf16>
    %79 = vector.shape_cast %78 : vector<8x8xbf16> to vector<1x8x8xbf16>
    %80 = vector.extract_strided_slice %51 {offsets = [0, 8], sizes = [8, 8], strides = [1, 1]} : vector<8x32xbf16> to vector<8x8xbf16>
    %81 = vector.shape_cast %80 : vector<8x8xbf16> to vector<1x8x8xbf16>
    %82 = vector.extract_strided_slice %53 {offsets = [0, 8], sizes = [8, 8], strides = [1, 1]} : vector<8x32xbf16> to vector<8x8xbf16>
    %83 = vector.shape_cast %82 : vector<8x8xbf16> to vector<1x8x8xbf16>
    "tpu.trace_start"() <{level = 10 : i32, message = "bqd,bkd->bqk"}> : () -> ()
    %cst_24 = arith.constant dense<0.000000e+00> : vector<1x8x8xf32>
    %84 = tpu.matmul %79, %81, %cst_24 {dimension_numbers = #tpu.dot_dimension_numbers<[2], [2], [1], [1], [0, 0, 0, 1, 1, 1], [0], [0]>} : vector<1x8x8xbf16>, vector<1x8x8xbf16>, vector<1x8x8xf32> -> vector<1x8x8xf32>
    "tpu.trace_stop"() : () -> ()
    %85 = vector.shape_cast %37 : vector<8x8xf32> to vector<1x8x8xf32>
    %86 = arith.addf %84, %85 : vector<1x8x8xf32>
    %cst_25 = arith.constant dense<0xFF800000> : vector<1x8xf32>
    %87 = vector.multi_reduction <maximumf>, %86, %cst_25 [2] : vector<1x8x8xf32> to vector<1x8xf32>
    %88 = vector.shape_cast %87 : vector<1x8xf32> to vector<1x8x1xf32>
    %89 = vector.broadcast %88 : vector<1x8x1xf32> to vector<1x8x8xf32>
    %90 = arith.subf %86, %89 : vector<1x8x8xf32>
    %91 = math.exp %90 : vector<1x8x8xf32>
    %cst_26 = arith.constant dense<0.000000e+00> : vector<1x8xf32>
    %92 = vector.multi_reduction <add>, %91, %cst_26 [2] : vector<1x8x8xf32> to vector<1x8xf32>
    %93 = vector.shape_cast %92 : vector<1x8xf32> to vector<1x8x1xf32>
    %94 = arith.truncf %91 : vector<1x8x8xf32> to vector<1x8x8xbf16>
    "tpu.trace_start"() <{level = 10 : i32, message = "bqk,bkd->bqd"}> : () -> ()
    %cst_27 = arith.constant dense<0.000000e+00> : vector<1x8x8xf32>
    %95 = tpu.matmul %94, %83, %cst_27 {dimension_numbers = #tpu.dot_dimension_numbers<[2], [1], [1], [2], [0, 0, 0, 1, 1, 2], [0], [0]>} : vector<1x8x8xbf16>, vector<1x8x8xbf16>, vector<1x8x8xf32> -> vector<1x8x8xf32>
    "tpu.trace_stop"() : () -> ()
    %96 = tpu.reciprocal %93 {approx = true} : vector<1x8x1xf32> -> vector<1x8x1xf32>
    %97 = vector.broadcast %96 : vector<1x8x1xf32> to vector<1x8x8xf32>
    %98 = arith.mulf %95, %97 : vector<1x8x8xf32>
    %99 = vector.shape_cast %98 : vector<1x8x8xf32> to vector<8x8xf32>
    %100 = arith.truncf %99 : vector<8x8xf32> to vector<8x8xbf16>
    %c0_28 = arith.constant 0 : index
    %c8 = arith.constant 8 : index
    %101 = vector.load %arg7[%c0_28, %c8] : memref<8x32xbf16, #tpu.memory_space<vmem>>, vector<8x8xbf16>
    tpu.vector_store %arg7[%c0_28, %c8], %100 {strides = array<i32>} : memref<8x32xbf16, #tpu.memory_space<vmem>>, vector<8x8xbf16>,
    %102 = vector.extract_strided_slice %49 {offsets = [0, 16], sizes = [8, 8], strides = [1, 1]} : vector<8x32xbf16> to vector<8x8xbf16>
    %103 = vector.shape_cast %102 : vector<8x8xbf16> to vector<1x8x8xbf16>
    %104 = vector.extract_strided_slice %51 {offsets = [0, 16], sizes = [8, 8], strides = [1, 1]} : vector<8x32xbf16> to vector<8x8xbf16>
    %105 = vector.shape_cast %104 : vector<8x8xbf16> to vector<1x8x8xbf16>
    %106 = vector.extract_strided_slice %53 {offsets = [0, 16], sizes = [8, 8], strides = [1, 1]} : vector<8x32xbf16> to vector<8x8xbf16>
    %107 = vector.shape_cast %106 : vector<8x8xbf16> to vector<1x8x8xbf16>
    "tpu.trace_start"() <{level = 10 : i32, message = "bqd,bkd->bqk"}> : () -> ()
    %cst_29 = arith.constant dense<0.000000e+00> : vector<1x8x8xf32>
    %108 = tpu.matmul %103, %105, %cst_29 {dimension_numbers = #tpu.dot_dimension_numbers<[2], [2], [1], [1], [0, 0, 0, 1, 1, 1], [0], [0]>} : vector<1x8x8xbf16>, vector<1x8x8xbf16>, vector<1x8x8xf32> -> vector<1x8x8xf32>
    "tpu.trace_stop"() : () -> ()
    %109 = vector.shape_cast %37 : vector<8x8xf32> to vector<1x8x8xf32>
    %110 = arith.addf %108, %109 : vector<1x8x8xf32>
    %cst_30 = arith.constant dense<0xFF800000> : vector<1x8xf32>
    %111 = vector.multi_reduction <maximumf>, %110, %cst_30 [2] : vector<1x8x8xf32> to vector<1x8xf32>
    %112 = vector.shape_cast %111 : vector<1x8xf32> to vector<1x8x1xf32>
    %113 = vector.broadcast %112 : vector<1x8x1xf32> to vector<1x8x8xf32>
    %114 = arith.subf %110, %113 : vector<1x8x8xf32>
    %115 = math.exp %114 : vector<1x8x8xf32>
    %cst_31 = arith.constant dense<0.000000e+00> : vector<1x8xf32>
    %116 = vector.multi_reduction <add>, %115, %cst_31 [2] : vector<1x8x8xf32> to vector<1x8xf32>
    %117 = vector.shape_cast %116 : vector<1x8xf32> to vector<1x8x1xf32>
    %118 = arith.truncf %115 : vector<1x8x8xf32> to vector<1x8x8xbf16>
    "tpu.trace_start"() <{level = 10 : i32, message = "bqk,bkd->bqd"}> : () -> ()
    %cst_32 = arith.constant dense<0.000000e+00> : vector<1x8x8xf32>
    %119 = tpu.matmul %118, %107, %cst_32 {dimension_numbers = #tpu.dot_dimension_numbers<[2], [1], [1], [2], [0, 0, 0, 1, 1, 2], [0], [0]>} : vector<1x8x8xbf16>, vector<1x8x8xbf16>, vector<1x8x8xf32> -> vector<1x8x8xf32>
    "tpu.trace_stop"() : () -> ()
    %120 = tpu.reciprocal %117 {approx = true} : vector<1x8x1xf32> -> vector<1x8x1xf32>
    %121 = vector.broadcast %120 : vector<1x8x1xf32> to vector<1x8x8xf32>
    %122 = arith.mulf %119, %121 : vector<1x8x8xf32>
    %123 = vector.shape_cast %122 : vector<1x8x8xf32> to vector<8x8xf32>
    %124 = arith.truncf %123 : vector<8x8xf32> to vector<8x8xbf16>
    %c0_33 = arith.constant 0 : index
    %c16 = arith.constant 16 : index
    %125 = vector.load %arg7[%c0_33, %c16] : memref<8x32xbf16, #tpu.memory_space<vmem>>, vector<8x8xbf16>
    tpu.vector_store %arg7[%c0_33, %c16], %124 {strides = array<i32>} : memref<8x32xbf16, #tpu.memory_space<vmem>>, vector<8x8xbf16>,
    %126 = vector.extract_strided_slice %49 {offsets = [0, 24], sizes = [8, 8], strides = [1, 1]} : vector<8x32xbf16> to vector<8x8xbf16>
    %127 = vector.shape_cast %126 : vector<8x8xbf16> to vector<1x8x8xbf16>
    %128 = vector.extract_strided_slice %51 {offsets = [0, 24], sizes = [8, 8], strides = [1, 1]} : vector<8x32xbf16> to vector<8x8xbf16>
    %129 = vector.shape_cast %128 : vector<8x8xbf16> to vector<1x8x8xbf16>
    %130 = vector.extract_strided_slice %53 {offsets = [0, 24], sizes = [8, 8], strides = [1, 1]} : vector<8x32xbf16> to vector<8x8xbf16>
    %131 = vector.shape_cast %130 : vector<8x8xbf16> to vector<1x8x8xbf16>
    "tpu.trace_start"() <{level = 10 : i32, message = "bqd,bkd->bqk"}> : () -> ()
    %cst_34 = arith.constant dense<0.000000e+00> : vector<1x8x8xf32>
    %132 = tpu.matmul %127, %129, %cst_34 {dimension_numbers = #tpu.dot_dimension_numbers<[2], [2], [1], [1], [0, 0, 0, 1, 1, 1], [0], [0]>} : vector<1x8x8xbf16>, vector<1x8x8xbf16>, vector<1x8x8xf32> -> vector<1x8x8xf32>
    "tpu.trace_stop"() : () -> ()
    %133 = vector.shape_cast %37 : vector<8x8xf32> to vector<1x8x8xf32>
    %134 = arith.addf %132, %133 : vector<1x8x8xf32>
    %cst_35 = arith.constant dense<0xFF800000> : vector<1x8xf32>
    %135 = vector.multi_reduction <maximumf>, %134, %cst_35 [2] : vector<1x8x8xf32> to vector<1x8xf32>
    %136 = vector.shape_cast %135 : vector<1x8xf32> to vector<1x8x1xf32>
    %137 = vector.broadcast %136 : vector<1x8x1xf32> to vector<1x8x8xf32>
    %138 = arith.subf %134, %137 : vector<1x8x8xf32>
    %139 = math.exp %138 : vector<1x8x8xf32>
    %cst_36 = arith.constant dense<0.000000e+00> : vector<1x8xf32>
    %140 = vector.multi_reduction <add>, %139, %cst_36 [2] : vector<1x8x8xf32> to vector<1x8xf32>
    %141 = vector.shape_cast %140 : vector<1x8xf32> to vector<1x8x1xf32>
    %142 = arith.truncf %139 : vector<1x8x8xf32> to vector<1x8x8xbf16>
    "tpu.trace_start"() <{level = 10 : i32, message = "bqk,bkd->bqd"}> : () -> ()
    %cst_37 = arith.constant dense<0.000000e+00> : vector<1x8x8xf32>
    %143 = tpu.matmul %142, %131, %cst_37 {dimension_numbers = #tpu.dot_dimension_numbers<[2], [1], [1], [2], [0, 0, 0, 1, 1, 2], [0], [0]>} : vector<1x8x8xbf16>, vector<1x8x8xbf16>, vector<1x8x8xf32> -> vector<1x8x8xf32>
    "tpu.trace_stop"() : () -> ()
    %144 = tpu.reciprocal %141 {approx = true} : vector<1x8x1xf32> -> vector<1x8x1xf32>
    %145 = vector.broadcast %144 : vector<1x8x1xf32> to vector<1x8x8xf32>
    %146 = arith.mulf %143, %145 : vector<1x8x8xf32>
    %147 = vector.shape_cast %146 : vector<1x8x8xf32> to vector<8x8xf32>
    %148 = arith.truncf %147 : vector<8x8xf32> to vector<8x8xbf16>
    %c0_38 = arith.constant 0 : index
    %c24 = arith.constant 24 : index
    %149 = vector.load %arg7[%c0_38, %c24] : memref<8x32xbf16, #tpu.memory_space<vmem>>, vector<8x8xbf16>
    tpu.vector_store %arg7[%c0_38, %c24], %148 {strides = array<i32>} : memref<8x32xbf16, #tpu.memory_space<vmem>>, vector<8x8xbf16>,
    %c0_39 = arith.constant 0 : index
    %c0_40 = arith.constant 0 : index
    %150 = vector.load %arg7[%c0_39, %c0_40] : memref<8x32xbf16, #tpu.memory_space<vmem>>, vector<8x32xbf16>
    %c0_41 = arith.constant 0 : index
    %c0_42 = arith.constant 0 : index
    %151 = vector.load %arg3[%c0_41, %c0_42] : memref<32x32xbf16, #tpu.memory_space<vmem>>, vector<32x32xbf16>
    %cst_43 = arith.constant dense<0.000000e+00> : vector<8x32xf32>
    %152 = tpu.matmul %150, %151, %cst_43 {dimension_numbers = #tpu.dot_dimension_numbers<[1], [0], [0], [1], [0, 0, 1, 1], [], []>} : vector<8x32xbf16>, vector<32x32xbf16>, vector<8x32xf32> -> vector<8x32xf32>
    %c0_44 = arith.constant 0 : index
    %c0_45 = arith.constant 0 : index
    %153 = vector.load %arg5[%c0_44, %c0_45] : memref<1x32xf32, #tpu.memory_space<vmem>>, vector<1x32xf32>
    %154 = vector.broadcast %153 : vector<1x32xf32> to vector<8x32xf32>
    %155 = arith.addf %152, %154 : vector<8x32xf32>
    %156 = vector.shape_cast %155 : vector<8x32xf32> to vector<1x8x32xf32>
    %c0_46 = arith.constant 0 : index
    %c0_47 = arith.constant 0 : index
    %c0_48 = arith.constant 0 : index
    %157 = vector.load %arg6[%c0_46, %c0_47, %c0_48] : memref<1x8x32xf32, #tpu.memory_space<vmem>>, vector<1x8x32xf32>
    tpu.vector_store %arg6[%c0_46, %c0_47, %c0_48], %156 {strides = array<i32>} : memref<1x8x32xf32, #tpu.memory_space<vmem>>, vector<1x8x32xf32>,
    return
  }
  func.func @transform_0(%arg0: i32) -> (i32, i32, i32) {
    %c0_i32 = arith.constant 0 : i32
    %c0_i32_0 = arith.constant 0 : i32
    %c0_i32_1 = arith.constant 0 : i32
    return %arg0, %c0_i32, %c0_i32_0 : i32, i32, i32
  }
  func.func @transform_1(%arg0: i32) -> (i32, i32) {
    %c0_i32 = arith.constant 0 : i32
    %c0_i32_0 = arith.constant 0 : i32
    %c0_i32_1 = arith.constant 0 : i32
    return %c0_i32, %c0_i32_0 : i32, i32
  }
  func.func @transform_2(%arg0: i32) -> (i32, i32) {
    %c0_i32 = arith.constant 0 : i32
    %c0_i32_0 = arith.constant 0 : i32
    %c0_i32_1 = arith.constant 0 : i32
    return %c0_i32, %c0_i32_0 : i32, i32
  }
  func.func @transform_3(%arg0: i32) -> (i32, i32) {
    %c0_i32 = arith.constant 0 : i32
    %c0_i32_0 = arith.constant 0 : i32
    %c0_i32_1 = arith.constant 0 : i32
    return %c0_i32, %c0_i32_0 : i32, i32
  }
  func.func @transform_4(%arg0: i32) -> (i32, i32) {
    %c0_i32 = arith.constant 0 : i32
    %c0_i32_0 = arith.constant 0 : i32
    %c0_i32_1 = arith.constant 0 : i32
    return %c0_i32, %c0_i32_0 : i32, i32
  }
  func.func @transform_5(%arg0: i32) -> (i32, i32, i32) {
    %c0_i32 = arith.constant 0 : i32
    %c0_i32_0 = arith.constant 0 : i32
    %c0_i32_1 = arith.constant 0 : i32
    return %arg0, %c0_i32, %c0_i32_0 : i32, i32, i32
  }
}

</mosaic_0001>

<bundles_post_ra>
// kernel: tpu_custom_call.1
= control target key start
LH: loop header
LB: loop body
LE: loop exit
PB: predicated region body
PF: predicated region fallthrough
CT: control target
= control target key end

     0   :  { %10 = vsyncpa [#allocation4], 0  ;;  %s1296_s0 = inlined_call_operand.hbm [shape: f32[2,8,32], index: 0, kind: input, shape index: {}]   ;;  %s1297_s1 = inlined_call_operand.hbm [shape: bf16[32,96], index: 1, kind: input, shape index: {}]   ;;  %s1298_s2 = inlined_call_operand.hbm [shape: bf16[32,32], index: 2, kind: input, shape index: {}]   ;;  %s1299_s3 = inlined_call_operand.vmem [shape: f32[1,96], index: 3, kind: input, shape index: {}]   ;;  %s1300_s4 = inlined_call_operand.vmem [shape: f32[1,32], index: 4, kind: input, shape index: {}]   ;;  %s1301_s5 = inlined_call_operand.hbm [shape: f32[2,8,32], index: 5, kind: output, shape index: {}]  }
   0x1   :  { %12 = vsyncpa [#allocation4 + $0x1], 0 }
   0x2   :  { %13 = vsyncpa [#allocation7], 0 }
   0x3   :  { %14 = vsyncpa [#allocation5], 0 }
   0x4   :  { %16 = vsyncpa [#allocation5 + $0x1], 0  ;;  %s1104_s18 = smov 0   ;;  %s1106_s19 = smov 0  }
   0x5   :  { %s1108_s20 = smov 0   ;;  %s1110_s21 = smov 0  }
   0x6 LB: > { %s174_s24 = sshll.u32 %s1297_s1, 4  ;;  %s1128_s25 = sadd.s32 4294967295, %s1053_s21   ;;  %s1053_s21 = sphi %s1110_s21, %s1312_s21   ;;  %s1049_s20 = sphi %s1108_s20, %s1311_s20   ;;  %s1045_s19 = sphi %s1106_s19, %s1310_s19   ;;  %s1041_s18 = sphi %s1104_s18, %s1309_s18   ;;  %s175_s24 = int_to_ptr.hbm [resolvable:$true] %s174_s24 }
   0x7   : > { %p746_p0 = scmp.ge.s32.totalorder %s1053_s21, 1  ;;  %p43_p1 = scmp.eq.s32.totalorder %s1128_s25, 0 }
   0x8   : > { %p163_p2 = scmp.lt.s32.totalorder %s1053_s21, 3  ;;  %s1055_s27 = smov [#allocation6]  }
   0x9   : > { %s176_s28 = sshll.u32 %s1055_s27, 4  ;;  %s188_s6 = sshll.u32 %s1298_s2, 4  ;;  %s177_s28 = int_to_ptr.vmem [resolvable:$true] %s176_s28  ;;  %s189_s6 = int_to_ptr.hbm [resolvable:$true] %s188_s6 }
   0xa   : > { %p1133_p3 = pnand %p746_p0, %p163_p2  ;;  %s1056_s7 = smov [#allocation8]  }
   0xb   : > { %s190_s8 = sshll.u32 %s1056_s7, 4  ;;  %s1057_s9 = smov 64   ;;  %s191_s8 = int_to_ptr.vmem [resolvable:$true] %s190_s8 }
   0xc   : > { %p803_p4 = pneg %p1133_p3  ;;  %s1058_s10 = smov 4  }
   0xd   : > { %s745_s11 = sadd.s32 4294967294, %s1053_s21   ;;  %s1147_s12 = sadd.s32 1, %s1053_s21  }
   0xe   : > { %p804_p6 = pnand %p803_p4, %p43_p1  ;;  %s26_s13 = ssub.s32 %s1053_s21, %s1147_s12 }
   0xf   : > { %s29_s14 = sadd.s32 1, %s1049_s20  ;;  %p27_p7 = scmp.eq.s32.totalorder %s26_s13, 0 }
  0x10   : > { %806 = dma.hbm_to_vmem [thread:$0]  (!%p804_p6), %s175_s24, 256, %s177_s28, [#allocation7], %s1057_s9, %s1057_s9, %s1058_s10  }
  0x11   : > { %809 = dma.hbm_to_vmem [thread:$0]  (!%p804_p6), %s189_s6, 256, %s191_s8, [#allocation7], %s1057_s9, %s1057_s9, %s1058_s10  }
  0x12   : > { %p36_p8 = scmp.ne.s32.totalorder %s1049_s20, %s1045_s19  ;;  %p37_p9 = scmp.eq.s32.totalorder %s1053_s21, 0 }
  0x13   : > { %p42_p10 = scmp.ne.s32.totalorder %s1045_s19, %s1041_s18  ;;  %p150_p13 = scmp.eq.s32.totalorder %s1128_s25, 1 }
  0x14   : > { %s1158_s15 = scalar_select %p27_p7, %s1049_s20, %s29_s14  }
  0x15   : > { %p1160_p11 = por %p37_p9, %p36_p8  ;;  %p1166_p12 = por %p43_p1, %p42_p10 }
  0x16   : > { %p156_p0 = scmp.eq.s32.totalorder %s745_s11, 1  ;;  %p820_p2 = scmp.lt.s32.totalorder %s1053_s21, 2 }
  0x17   : > { %s210_s22 = sand.u32 1, %s1049_s20   ;;  %p1173_p4 = por %p150_p13, %p36_p8 }
  0x18   : > { %p1177_p6 = por %p156_p0, %p42_p10  ;;  %s750_s27 = sshll.u32 %s210_s22, 3 }
  0x19   : > { %s751_s28 = sshll.u32 %s1053_s21, 3  ;;  %s214_s7 = scalar_lea.vmem [#allocation3], %s750_s27 }
  0x1a   : > { %s218_s6 = scalar_lea.hbm %s1296_s0, %s751_s28  ;;  %s222_s8 = sshll.u32 %s214_s7, 4  ;;  %s223_s8 = int_to_ptr.vmem [resolvable:$true] %s222_s8 }
  0x1b   : > { %s220_s9 = sshll.u32 %s218_s6, 4  ;;  %p1187_p7 = pnand %p820_p2, %p1160_p11  ;;  %s221_s9 = int_to_ptr.hbm [resolvable:$true] %s220_s9 }
  0x1c   : > { %s211_s11 = scalar_lea.sflag [#allocation4], %s210_s22  ;;  %s953_s13 = sshra.s32 %s221_s9, 4  ;;  %s954_s13 = int_to_ptr.hbm [resolvable:$true] %s953_s13 }
  0x1d   : > { %s955_s14 = scalar_lea.hbm %s954_s13, 8  ;;  %p957_p9 = pneg %p1187_p7 }
  0x1e   : > { %p956_p8 = scmp.ne.s32.totalorder %s954_s13, %s955_s14  ;;  %s960_s29 = scalar_lea.hbm %s1296_s0, 16 }
  0x1f   : > { %p961_p11 = scmp.lt.s32.totalorder %s954_s13, %s1296_s0  ;;  %p962_p0 = scmp.lt.s32.totalorder %s960_s29, %s955_s14 }
  0x20   : > { %p958_p10 = pnand %p957_p9, %p956_p8 }
  0x21   : > { %p963_p2 = por %p962_p0, %p961_p11 }
  0x22   : > { %p959_p13 = pneg %p958_p10 }
  0x24   : > { %p964_p5 = pnand %p963_p2, %p959_p13 }
  0x26   : > { %967 = shalt.err (!%p964_p5)
}
  0x27   : > { %813 = dma.hbm_to_vmem [thread:$0]  (!%p1187_p7), %s221_s9, 128, %s223_s8, %s211_s11  }
  0x28   : > { %231 = sbr.rel (%p1133_p3) target bundleno = 996 (0x3e4), region = 40  ;;  %s1204_s22 = sand.u32 (!%p1133_p3), 1, %s1045_s19  }
  0x29   : > { %s753_s6 = sshll.u32 (!%p1133_p3), %s1204_s22, 3  ;;  %s234_s7 = scalar_lea.sflag (!%p1133_p3), [#allocation4], %s1204_s22 }
  0x2a   : > { %s237_s13 = scalar_lea.vmem (!%p1133_p3), [#allocation3], %s753_s6 }
  0x2d   : > { %1028 = dma.done.wait (%p1166_p12), %s234_s7, 128  }
  0x2e   : > { %1030 = vsyncadd (%p1166_p12), %s234_s7, 4294967168 }
  0x2f   : > { %1032 = dma.done.wait (%p43_p1), [#allocation7], 512  }
  0x30   : > { %1034 = vsyncadd (%p43_p1), [#allocation7], 4294966784  ;;  %v788_v0 = vld [vmem:[#allocation6 + $0x8] sm:$0xff]  ;;  %v787_v1 = vld [vmem:[#allocation6] sm:$0xff]  ;;  %vm328_vm0 = vcmask 261120   ;;  %s1059_s17 = smov 96   ;;  %v276_v30 = vlaneseq }
  0x31   : > { %338 = vmatpush.bf16.msra.mxu0 %v788_v0  ;;  %v306_v2 = vld [vmem:[%s237_s13] sm:$0xff]  ;;  %v875_v4 = vld [vmem:[%s1299_s3] ss:$0 sm:$0xff]  ;;  %s1060_s9 = smov 104   ;;  %s1061_s10 = smov 120   ;;  %vm353_vm1 = vcmask 64512  }
  0x32   : > { %v307_v3 = vpack.c.bf16 %v306_v2, %v306_v2  ;;  %s1062_s11 = smov 88   ;;  %s1063_s14 = smov 80   ;;  %vm388_vm2 = vcmask 1043456   ;;  %v277_v31 = vshrl.u32 %v276_v30, 7  ;;  %v279_v32 = vand.u32 127, %v276_v30 }
  0x33   : > { %s1064_s27 = smov 72   ;;  %s1065_s28 = smov 112   ;;  %v1068_v35 = vmov -1e+30   ;;  %vm408_vm4 = vcmask 60416   ;;  %vm474_vm5 = vcmask 126016  }
  0x34   : > { %s1066_s29 = smov 64   ;;  %s1067_s30 = smov 56   ;;  %v284_v33 = vand.u32 1, %v277_v31  ;;  %v296_v34 = vand.u32 1, %v279_v32  ;;  %vm537_vm6 = vcmask 191616   ;;  %vm600_vm7 = vcmask 257216  }
  0x35   : > { %339 = vmatpush.bf16.msra.mxu0 %v787_v1  ;;  %s1069_s16 = smov 48   ;;  %s1070_s7 = smov 40  }
  0x36   : > { %vm304_vm3 = vcmp.ge.s32.totalorder %v284_v33, %v296_v34  ;;  %s1071_s13 = smov 8   ;;  %s1072_s26 = smov 16  }
  0x37   : > { %v305_v36 = vsel %vm304_vm3, 0.0, %v1068_v35  ;;  %s1073_s8 = smov 24  }
  0x38   : > { %765 = vmatmul.msk.bf16.vlgmr.msra.gmra.mxu0 %vm328_vm0, %v307_v3 }
  0xb5   : > { %v341_v5 = vpop.f32.mrf.mxu0 }
  0xb6   : > { %v342_v6 = vadd.f32 %v875_v4, %v341_v5 }
  0xb8   : > { %v345_v7 = vmul.f32 0.35355338, %v342_v6  ;;  %v347_v8 = vpack.c.bf16 %v342_v6, %v342_v6 }
  0xba   : > { %v346_v9 = vpack.c.bf16 %v345_v7, %v345_v7  ;;  %v349_v10 = vunpack.c.l.b16 %v347_v8 }
  0xbc   : > { %v1222_v11 = vpack.c.b16 %v349_v10, %v349_v10  ;;  %v411_v12 = vunpack.c.l.b16 %v346_v9 }
  0xbd   : > { %v343_v13 = vpop.f32.mrf.mxu0 }
  0xbe   : > { %351 = vrot.lane.b32.xlu0 %v1222_v11, %s1059_s17  ;;  %v412_v14 = vpack.c.b16 %v411_v12, %v411_v12  ;;  %s784_s17 = sshll.u32 %s1128_s25, 3  ;;  %s641_s25 = scalar_lea.sflag [#allocation5], %s1204_s22 }
  0xc0   : > { %539 = vrot.lane.b32.xlu2 %v412_v14, %s1060_s9  ;;  %413 = vrot.lane.b32.xlu1 %v412_v14, %s1061_s10 }
  0xc6   : > { %415 = vrot.lane.b32.xlu0 %v1222_v11, %s1062_s11  ;;  %s651_s11 = scalar_lea.hbm %s1301_s5, %s784_s17 }
  0xc8   : > { %478 = vrot.lane.b32.xlu2 %v1222_v11, %s1063_s14  ;;  %541 = vrot.lane.b32.xlu1 %v1222_v11, %s1064_s27 }
  0xce   : > { %476 = vrot.lane.b32.xlu0 %v412_v14, %s1065_s28  ;;  %s274_s28 = scalar_lea.vmem [#allocation9], %s753_s6  ;;  %s1003_s6 = scalar_lea.hbm %s1301_s5, 16 }
  0xd0   : > { %383 = vrot.lane.b32.xlu2 %v1222_v11, %s1066_s29  ;;  %s653_s29 = sshll.u32 %s274_s28, 4  ;;  %s654_s29 = int_to_ptr.vmem [resolvable:$true] %s653_s29 }
  0xd8   : > { %446 = vrot.lane.b32.xlu2 %v1222_v11, %s1067_s30  ;;  %s655_s30 = sshll.u32 %s651_s11, 4  ;;  %s656_s30 = int_to_ptr.hbm [resolvable:$true] %s655_s30 }
 0x11a   : > { %v540_v15 = vpop.permute.xlu2 %539 }
 0x122   : > { %v479_v16 = vpop.permute.xlu2 %478 }
 0x123   : > { %v484_v17 = vsel %vm353_vm1, %v479_v16, 0 }
 0x124   : > { %493 = vmatpush.bf16.xpose.msrb.mxu0 %v484_v17 }
 0x12a   : > { %v384_v18 = vpop.permute.xlu2 %383 }
 0x12b   : > { %v390_v19 = vsel %vm388_vm2, %v384_v18, 0 }
 0x12c   : > { %399 = vmatpush.bf16.msra.mxu2 %v390_v19 }
 0x130   : > { %v352_v20 = vpop.permute.xlu0 %351 }
 0x131   : > { %v358_v21 = vsel %vm353_vm1, %v352_v20, 0 }
 0x132   : > { %367 = vmatpush.bf16.xpose.msra.mxu1 %v358_v21  ;;  %v447_v22 = vpop.permute.xlu2 %446  ;;  %v414_v23 = vpop.permute.xlu1 %413 }
 0x133   : > { %v452_v24 = vsel %vm388_vm2, %v447_v22, 0 }
 0x134   : > { %461 = vmatpush.bf16.msrb.mxu2 %v452_v24 }
 0x138   : > { %v416_v25 = vpop.permute.xlu0 %415 }
 0x139   : > { %766 = vmatmul.msk.bf16.vlgmr.msra.gmra.mxu1 %vm353_vm1, %v346_v9  ;;  %v421_v26 = vsel %vm353_vm1, %v416_v25, 0 }
 0x13a   : > { %430 = vmatpush.bf16.xpose.msra.mxu3 %v421_v26  ;;  %v542_v27 = vpop.permute.xlu1 %541 }
 0x13b   : > { %v547_v28 = vsel %vm353_vm1, %v542_v27, 0 }
 0x140   : > { %v477_v29 = vpop.permute.xlu0 %476 }
 0x141   : > { %768 = vmatmul.msk.bf16.vlgmr.msra.gmra.mxu3 %vm353_vm1, %v414_v23  ;;  %770 = vmatmul.msk.bf16.vlgmr.msrb.gmra.mxu0 %vm353_vm1, %v477_v29 }
 0x142   : > { %556 = vmatpush.bf16.xpose.msrb.mxu3 %v547_v28 }
 0x151   : > { %772 = vmatmul.msk.bf16.vlgmr.msrb.gmra.mxu3 %vm353_vm1, %v540_v15 }
 0x1b6   : > { %v369_v37 = vpop.f32.mrf.mxu1 }
 0x1b7   : > { %v370_v38 = vadd.f32 %v369_v37, %v305_v36 }
 0x1b9   : > { %v373_v39 = vsel %vm353_vm1, %v370_v38, -inf }
 0x1ba   : > { %374 = vmax.xlane.f32.xlu1 %v373_v39 }
 0x1be   : > { %v371_v40 = vpop.f32.mrf.mxu1  ;;  %v495_v41 = vpop.f32.mrf.mxu0 }
 0x1bf   : > { %v496_v42 = vadd.f32 %v495_v41, %v305_v36  ;;  %v790_v41 = vld [vmem:[#allocation8 + $0x8] sm:$0xff] }
 0x1c0   : > { %632 = vmatpush.bf16.msra.mxu0 %v790_v41 }
 0x1c1   : > { %v499_v43 = vsel %vm353_vm1, %v496_v42, -inf }
 0x1c2   : > { %500 = vmax.xlane.f32.xlu1 %v499_v43 }
 0x1c4   : > { %v432_v44 = vpop.f32.mrf.mxu3 }
 0x1c5   : > { %v433_v45 = vadd.f32 %v432_v44, %v305_v36 }
 0x1c6   : > { %v497_v46 = vpop.f32.mrf.mxu0 }
 0x1c7   : > { %v436_v47 = vsel %vm353_vm1, %v433_v45, -inf }
 0x1c8   : > { %437 = vmax.xlane.f32.xlu0 %v436_v47  ;;  %v876_v47 = vld [vmem:[%s1300_s4] ss:$0 sm:$0xff] }
 0x1cc   : > { %v434_v48 = vpop.f32.mrf.mxu3 }
 0x1d4   : > { %v558_v49 = vpop.f32.mrf.mxu3 }
 0x1d5   : > { %v559_v50 = vadd.f32 %v558_v49, %v305_v36 }
 0x1d7   : > { %v562_v51 = vsel %vm353_vm1, %v559_v50, -inf }
 0x1d8   : > { %563 = vmax.xlane.f32.xlu2 %v562_v51 }
 0x1db   : > { %509 = vrot.lane.b32.xlu1 %v1222_v11, %s1069_s16  ;;  %s997_s16 = sshra.s32 %s656_s30, 4  ;;  %s998_s16 = int_to_ptr.hbm [resolvable:$true] %s997_s16 }
 0x1dc   : > { %572 = vrot.lane.b32.xlu0 %v1222_v11, %s1070_s7  ;;  %v560_v52 = vpop.f32.mrf.mxu3  ;;  %s999_s7 = scalar_lea.hbm %s998_s16, 8  ;;  %p1004_p12 = scmp.lt.s32.totalorder %s998_s16, %s1301_s5 }
 0x1dd   : > { %p1000_p1 = scmp.ne.s32.totalorder %s998_s16, %s999_s7  ;;  %p1005_p7 = scmp.lt.s32.totalorder %s1003_s6, %s999_s7 }
 0x1df   : > { %p1001_p3 = pnand %p1000_p1, %p1173_p4  ;;  %p1006_p8 = por %p1005_p7, %p1004_p12 }
 0x1e1   : > { %p1002_p5 = pneg %p1001_p3 }
 0x1e3   : > { %p1007_p9 = pnand %p1006_p8, %p1002_p5 }
 0x22d   : > { %v375_v53 = vpop.xlane.xlu1 %374 }
 0x22e   : > { %v376_v54 = vsub.f32 %v370_v38, %v375_v53 }
 0x230   : > { %v377_v55 = vmul.f32 1.442695, %v376_v54 }
 0x232   : > { %877 = vpow2.f32 %v377_v55 }
 0x235   : > { %v501_v58 = vpop.xlane.xlu1 %500 }
 0x236   : > { %v502_v61 = vsub.f32 %v496_v42, %v501_v58  ;;  %v789_v42 = vld [vmem:[#allocation8] sm:$0xff] }
 0x237   : > { %633 = vmatpush.bf16.msra.mxu0 %v789_v42 }
 0x238   : > { %v878_v56 = vpop.eup %877  ;;  %v503_v63 = vmul.f32 1.442695, %v502_v61 }
 0x239   : > { %v382_v57 = vpack.c.bf16 %v878_v56, %v878_v56  ;;  %v379_v15 = vsel %vm353_vm1, %v878_v56, 0.0 }
 0x23b   : > { %v438_v59 = vpop.xlane.xlu0 %437  ;;  %767 = vmatmul.msk.bf16.vlgmr.msra.gmra.mxu2 %vm353_vm1, %v382_v57 }
 0x23c   : > { %v439_v60 = vsub.f32 %v433_v45, %v438_v59 }
 0x23e   : > { %v440_v62 = vmul.f32 1.442695, %v439_v60 }
 0x240   : > { %879 = vpow2.f32 %v440_v62 }
 0x241   : > { %881 = vpow2.f32 %v503_v63 }
 0x246   : > { %v880_v0 = vpop.eup %879 }
 0x247   : > { %v442_v1 = vsel %vm353_vm1, %v880_v0, 0.0  ;;  %v445_v2 = vpack.c.bf16 %v880_v0, %v880_v0  ;;  %v882_v4 = vpop.eup %881 }
 0x248   : > { %443 = vadd.xlane.f32.xlu2 %v442_v1  ;;  %v505_v11 = vsel %vm353_vm1, %v882_v4, 0.0  ;;  %v508_v12 = vpack.c.bf16 %v882_v4, %v882_v4 }
 0x24b   : > { %v564_v3 = vpop.xlane.xlu2 %563  ;;  %769 = vmatmul.msk.bf16.vlgmr.msrb.gmra.mxu2 %vm353_vm1, %v445_v2 }
 0x24c   : > { %v565_v5 = vsub.f32 %v559_v50, %v564_v3 }
 0x24d   : > { %v510_v6 = vpop.permute.xlu1 %509 }
 0x24e   : > { %v566_v7 = vmul.f32 1.442695, %v565_v5  ;;  %v573_v8 = vpop.permute.xlu0 %572  ;;  %v515_v9 = vsel %vm388_vm2, %v510_v6, 0 }
 0x24f   : > { %v578_v10 = vsel %vm388_vm2, %v573_v8, 0  ;;  %524 = vmatpush.bf16.msrb.mxu1 %v515_v9 }
 0x250   : > { %883 = vpow2.f32 %v566_v7  ;;  %587 = vmatpush.bf16.msra.mxu2 %v578_v10  ;;  %506 = vadd.xlane.f32.xlu2 %v505_v11 }
 0x252   : > { %771 = vmatmul.msk.bf16.vlgmr.msrb.gmra.mxu1 %vm353_vm1, %v508_v12 }
 0x256   : > { %v884_v13 = vpop.eup %883 }
 0x257   : > { %v568_v14 = vsel %vm353_vm1, %v884_v13, 0.0  ;;  %v571_v16 = vpack.c.bf16 %v884_v13, %v884_v13 }
 0x258   : > { %569 = vadd.xlane.f32.xlu0 %v568_v14  ;;  %380 = vadd.xlane.f32.xlu2 %v379_v15 }
 0x25b   : > { %773 = vmatmul.msk.bf16.vlgmr.msra.gmra.mxu2 %vm353_vm1, %v571_v16 }
 0x2bb   : > { %v444_v17 = vpop.xlane.xlu2 %443 }
 0x2bc   : > { %885 = vrcp.f32 %v444_v17 }
 0x2be   : > { %v401_v18 = vpop.f32.mrf.mxu2 }
 0x2c2   : > { %v886_v22 = vpop.eup %885 }
 0x2c3   : > { %v507_v19 = vpop.xlane.xlu2 %506 }
 0x2c4   : > { %887 = vrcp.f32 %v507_v19 }
 0x2c6   : > { %v403_v20 = vpop.f32.mrf.mxu2 }
 0x2ca   : > { %v888_v24 = vpop.eup %887 }
 0x2cb   : > { %v381_v21 = vpop.xlane.xlu2 %380  ;;  %v570_v32 = vpop.xlane.xlu0 %569 }
 0x2cc   : > { %889 = vrcp.f32 %v381_v21 }
 0x2cd   : > { %891 = vrcp.f32 %v570_v32 }
 0x2ce   : > { %v463_v23 = vpop.f32.mrf.mxu2 }
 0x2cf   : > { %v468_v25 = vmul.f32 %v886_v22, %v463_v23  ;;  %v526_v26 = vpop.f32.mrf.mxu1 }
 0x2d0   : > { %v531_v27 = vmul.f32 %v888_v24, %v526_v26 }
 0x2d1   : > { %v469_v28 = vpack.c.bf16 %v468_v25, %v468_v25 }
 0x2d2   : > { %v532_v29 = vpack.c.bf16 %v531_v27, %v531_v27  ;;  %v890_v30 = vpop.eup %889 }
 0x2d3   : > { %471 = vrot.lane.b32.xlu1 %v469_v28, %s1071_s13  ;;  %v406_v31 = vmul.f32 %v890_v30, %v401_v18  ;;  %v892_v36 = vpop.eup %891 }
 0x2d4   : > { %534 = vrot.lane.b32.xlu2 %v532_v29, %s1072_s26 }
 0x2d5   : > { %v407_v33 = vpack.c.bf16 %v406_v31, %v406_v31 }
 0x2d6   : > { %v465_v34 = vpop.f32.mrf.mxu2 }
 0x2d7   : > { %v528_v35 = vpop.f32.mrf.mxu1  ;;  %409 = vst.msk [vmem:[#allocation2] sm:$0xf] %vm408_vm4, %v407_v33 }
 0x2de   : > { %v589_v37 = vpop.f32.mrf.mxu2 }
 0x2df   : > { %v594_v38 = vmul.f32 %v892_v36, %v589_v37 }
 0x2e1   : > { %v595_v39 = vpack.c.bf16 %v594_v38, %v594_v38 }
 0x2e3   : > { %597 = vrot.lane.b32.xlu1 %v595_v39, %s1073_s8 }
 0x2e6   : > { %v591_v40 = vpop.f32.mrf.mxu2 }
 0x32e   : > { %v535_v44 = vpop.permute.xlu2 %534 }
 0x345   : > { %v472_v43 = vpop.permute.xlu1 %471 }
 0x346   : > { %475 = vst.msk [vmem:[#allocation2] sm:$0xf] %vm474_vm5, %v472_v43 }
 0x347   : > { %538 = vst.msk [vmem:[#allocation2] sm:$0xf] %vm537_vm6, %v535_v44 }
 0x355   : > { %v598_v45 = vpop.permute.xlu1 %597 }
 0x356   : > { %601 = vst.msk [vmem:[#allocation2] sm:$0xf] %vm600_vm7, %v598_v45 }
 0x35d   : > { %v602_v46 = vld [vmem:[#allocation2] sm:$0xf] }
 0x35e   : > { %782 = vmatmul.msk.bf16.vlgmr.msra.gmra.mxu0 %vm328_vm0, %v602_v46 }
 0x3db   : > { %v635_v48 = vpop.f32.mrf.mxu0 }
 0x3dc   : > { %v636_v49 = vadd.f32 %v876_v47, %v635_v48 }
 0x3de   : > { %639 = vst.msk [vmem:[%s274_s28] sm:$0xff] %vm328_vm0, %v636_v49 }
 0x3df   : > { %1010 = shalt.err (!%p1007_p9)
}
 0x3e0   : > { %801 = dma.vmem_to_hbm [thread:$0]  (%p1173_p4), %s654_s29, 128, %s656_s30, %s641_s25  }
 0x3e3   : > { %v637_v50 = vpop.f32.mrf.mxu0 }
 0x3e4 PF: > { %s667_s22 = sand.u32 1, %s1041_s18   ;;  %p1308_p10 = scmp.ge.s32.totalorder %s1053_s21, 2 }
 0x3e5   : > { %s668_s9 = scalar_lea.sflag [#allocation5], %s667_s22 }
 0x3e6   : > { %p815_p13 = pnand %p1308_p10, %p1177_p6 }
 0x3e8   : > { %p816_p11 = pneg %p815_p13 }
 0x3ea   : > { %1036 = dma.done.wait (%p816_p11), %s668_s9, 128  }
 0x3eb   : > { %1038 = vsyncadd (%p816_p11), %s668_s9, 4294967168  ;;  %p19_p0 = scmp.ge.s32.totalorder %s1147_s12, 4   ;;  %s1309_s18 = smov %s1045_s19 }
 0x3ec   : > { %s1310_s19 = smov %s1049_s20  ;;  %s1311_s20 = smov %s1158_s15 }
 0x3ed   : > { %s1312_s21 = smov %s1147_s12  ;;  %21 = sbr.rel (!%p19_p0) target bundleno = 6 (0x6), region = 93 }
 0x3f2   :  { %674 = vsyncpa [#allocation4], 1 }
 0x3f3   :  { %676 = vsyncpa [#allocation4 + $0x1], 1 }
 0x3f4   :  { %677 = vsyncpa [#allocation7], 1 }
 0x3f5   :  { %678 = vsyncpa [#allocation5], 1 }
 0x3f6   :  { %680 = vsyncpa [#allocation5 + $0x1], 1 }

// kernel: tpu_custom_call.1
= control target key start
LH: loop header
LB: loop body
LE: loop exit
PB: predicated region body
PF: predicated region fallthrough
CT: control target
= control target key end

     0   :  { %10 = vsyncpa [#allocation4], 0  ;;  %s1296_s0 = inlined_call_operand.hbm [shape: f32[2,8,32], index: 0, kind: input, shape index: {}]   ;;  %s1297_s1 = inlined_call_operand.hbm [shape: bf16[32,96], index: 1, kind: input, shape index: {}]   ;;  %s1298_s2 = inlined_call_operand.hbm [shape: bf16[32,32], index: 2, kind: input, shape index: {}]   ;;  %s1299_s3 = inlined_call_operand.vmem [shape: f32[1,96], index: 3, kind: input, shape index: {}]   ;;  %s1300_s4 = inlined_call_operand.vmem [shape: f32[1,32], index: 4, kind: input, shape index: {}]   ;;  %s1301_s5 = inlined_call_operand.hbm [shape: f32[2,8,32], index: 5, kind: output, shape index: {}]  }
   0x1   :  { %12 = vsyncpa [#allocation4 + $0x1], 0 }
   0x2   :  { %13 = vsyncpa [#allocation7], 0 }
   0x3   :  { %14 = vsyncpa [#allocation5], 0 }
   0x4   :  { %16 = vsyncpa [#allocation5 + $0x1], 0  ;;  %s1104_s18 = smov 0   ;;  %s1106_s19 = smov 0  }
   0x5   :  { %s1108_s20 = smov 0   ;;  %s1110_s21 = smov 0  }
   0x6 LB: > { %s174_s24 = sshll.u32 %s1297_s1, 4  ;;  %s1128_s25 = sadd.s32 4294967295, %s1053_s21   ;;  %s1053_s21 = sphi %s1110_s21, %s1312_s21   ;;  %s1049_s20 = sphi %s1108_s20, %s1311_s20   ;;  %s1045_s19 = sphi %s1106_s19, %s1310_s19   ;;  %s1041_s18 = sphi %s1104_s18, %s1309_s18   ;;  %s175_s24 = int_to_ptr.hbm [resolvable:$true] %s174_s24 }
   0x7   : > { %p746_p0 = scmp.ge.s32.totalorder %s1053_s21, 1  ;;  %p43_p1 = scmp.eq.s32.totalorder %s1128_s25, 0 }
   0x8   : > { %p163_p2 = scmp.lt.s32.totalorder %s1053_s21, 3  ;;  %s1055_s27 = smov [#allocation6]  }
   0x9   : > { %s176_s28 = sshll.u32 %s1055_s27, 4  ;;  %s188_s6 = sshll.u32 %s1298_s2, 4  ;;  %s177_s28 = int_to_ptr.vmem [resolvable:$true] %s176_s28  ;;  %s189_s6 = int_to_ptr.hbm [resolvable:$true] %s188_s6 }
   0xa   : > { %p1133_p3 = pnand %p746_p0, %p163_p2  ;;  %s1056_s7 = smov [#allocation8]  }
   0xb   : > { %s190_s8 = sshll.u32 %s1056_s7, 4  ;;  %s1057_s9 = smov 64   ;;  %s191_s8 = int_to_ptr.vmem [resolvable:$true] %s190_s8 }
   0xc   : > { %p803_p4 = pneg %p1133_p3  ;;  %s1058_s10 = smov 4  }
   0xd   : > { %s745_s11 = sadd.s32 4294967294, %s1053_s21   ;;  %s1147_s12 = sadd.s32 1, %s1053_s21  }
   0xe   : > { %p804_p6 = pnand %p803_p4, %p43_p1  ;;  %s26_s13 = ssub.s32 %s1053_s21, %s1147_s12 }
   0xf   : > { %s29_s14 = sadd.s32 1, %s1049_s20  ;;  %p27_p7 = scmp.eq.s32.totalorder %s26_s13, 0 }
  0x10   : > { %806 = dma.hbm_to_vmem [thread:$0]  (!%p804_p6), %s175_s24, 256, %s177_s28, [#allocation7], %s1057_s9, %s1057_s9, %s1058_s10  }
  0x11   : > { %809 = dma.hbm_to_vmem [thread:$0]  (!%p804_p6), %s189_s6, 256, %s191_s8, [#allocation7], %s1057_s9, %s1057_s9, %s1058_s10  }
  0x12   : > { %p36_p8 = scmp.ne.s32.totalorder %s1049_s20, %s1045_s19  ;;  %p37_p9 = scmp.eq.s32.totalorder %s1053_s21, 0 }
  0x13   : > { %p42_p10 = scmp.ne.s32.totalorder %s1045_s19, %s1041_s18  ;;  %p150_p13 = scmp.eq.s32.totalorder %s1128_s25, 1 }
  0x14   : > { %s1158_s15 = scalar_select %p27_p7, %s1049_s20, %s29_s14  }
  0x15   : > { %p1160_p11 = por %p37_p9, %p36_p8  ;;  %p1166_p12 = por %p43_p1, %p42_p10 }
  0x16   : > { %p156_p0 = scmp.eq.s32.totalorder %s745_s11, 1  ;;  %p820_p2 = scmp.lt.s32.totalorder %s1053_s21, 2 }
  0x17   : > { %s210_s22 = sand.u32 1, %s1049_s20   ;;  %p1173_p4 = por %p150_p13, %p36_p8 }
  0x18   : > { %p1177_p6 = por %p156_p0, %p42_p10  ;;  %s750_s27 = sshll.u32 %s210_s22, 3 }
  0x19   : > { %s751_s28 = sshll.u32 %s1053_s21, 3  ;;  %s214_s7 = scalar_lea.vmem [#allocation3], %s750_s27 }
  0x1a   : > { %s218_s6 = scalar_lea.hbm %s1296_s0, %s751_s28  ;;  %s222_s8 = sshll.u32 %s214_s7, 4  ;;  %s223_s8 = int_to_ptr.vmem [resolvable:$true] %s222_s8 }
  0x1b   : > { %s220_s9 = sshll.u32 %s218_s6, 4  ;;  %p1187_p7 = pnand %p820_p2, %p1160_p11  ;;  %s221_s9 = int_to_ptr.hbm [resolvable:$true] %s220_s9 }
  0x1c   : > { %s211_s11 = scalar_lea.sflag [#allocation4], %s210_s22  ;;  %s953_s13 = sshra.s32 %s221_s9, 4  ;;  %s954_s13 = int_to_ptr.hbm [resolvable:$true] %s953_s13 }
  0x1d   : > { %s955_s14 = scalar_lea.hbm %s954_s13, 8  ;;  %p957_p9 = pneg %p1187_p7 }
  0x1e   : > { %p956_p8 = scmp.ne.s32.totalorder %s954_s13, %s955_s14  ;;  %s960_s29 = scalar_lea.hbm %s1296_s0, 16 }
  0x1f   : > { %p961_p11 = scmp.lt.s32.totalorder %s954_s13, %s1296_s0  ;;  %p962_p0 = scmp.lt.s32.totalorder %s960_s29, %s955_s14 }
  0x20   : > { %p958_p10 = pnand %p957_p9, %p956_p8 }
  0x21   : > { %p963_p2 = por %p962_p0, %p961_p11 }
  0x22   : > { %p959_p13 = pneg %p958_p10 }
  0x24   : > { %p964_p5 = pnand %p963_p2, %p959_p13 }
  0x26   : > { %967 = shalt.err (!%p964_p5)
}
  0x27   : > { %813 = dma.hbm_to_vmem [thread:$0]  (!%p1187_p7), %s221_s9, 128, %s223_s8, %s211_s11  }
  0x28   : > { %231 = sbr.rel (%p1133_p3) target bundleno = 996 (0x3e4), region = 40  ;;  %s1204_s22 = sand.u32 (!%p1133_p3), 1, %s1045_s19  }
  0x29   : > { %s753_s6 = sshll.u32 (!%p1133_p3), %s1204_s22, 3  ;;  %s234_s7 = scalar_lea.sflag (!%p1133_p3), [#allocation4], %s1204_s22 }
  0x2a   : > { %s237_s13 = scalar_lea.vmem (!%p1133_p3), [#allocation3], %s753_s6 }
  0x2d   : > { %1028 = dma.done.wait (%p1166_p12), %s234_s7, 128  }
  0x2e   : > { %1030 = vsyncadd (%p1166_p12), %s234_s7, 4294967168 }
  0x2f   : > { %1032 = dma.done.wait (%p43_p1), [#allocation7], 512  }
  0x30   : > { %1034 = vsyncadd (%p43_p1), [#allocation7], 4294966784  ;;  %v788_v0 = vld [vmem:[#allocation6 + $0x8] sm:$0xff]  ;;  %v787_v1 = vld [vmem:[#allocation6] sm:$0xff]  ;;  %vm328_vm0 = vcmask 261120   ;;  %s1059_s17 = smov 96   ;;  %v276_v30 = vlaneseq }
  0x31   : > { %338 = vmatpush.bf16.msra.mxu0 %v788_v0  ;;  %v306_v2 = vld [vmem:[%s237_s13] sm:$0xff]  ;;  %v875_v4 = vld [vmem:[%s1299_s3] ss:$0 sm:$0xff]  ;;  %s1060_s9 = smov 104   ;;  %s1061_s10 = smov 120   ;;  %vm353_vm1 = vcmask 64512  }
  0x32   : > { %v307_v3 = vpack.c.bf16 %v306_v2, %v306_v2  ;;  %s1062_s11 = smov 88   ;;  %s1063_s14 = smov 80   ;;  %vm388_vm2 = vcmask 1043456   ;;  %v277_v31 = vshrl.u32 %v276_v30, 7  ;;  %v279_v32 = vand.u32 127, %v276_v30 }
  0x33   : > { %s1064_s27 = smov 72   ;;  %s1065_s28 = smov 112   ;;  %v1068_v35 = vmov -1e+30   ;;  %vm408_vm4 = vcmask 60416   ;;  %vm474_vm5 = vcmask 126016  }
  0x34   : > { %s1066_s29 = smov 64   ;;  %s1067_s30 = smov 56   ;;  %v284_v33 = vand.u32 1, %v277_v31  ;;  %v296_v34 = vand.u32 1, %v279_v32  ;;  %vm537_vm6 = vcmask 191616   ;;  %vm600_vm7 = vcmask 257216  }
  0x35   : > { %339 = vmatpush.bf16.msra.mxu0 %v787_v1  ;;  %s1069_s16 = smov 48   ;;  %s1070_s7 = smov 40  }
  0x36   : > { %vm304_vm3 = vcmp.ge.s32.totalorder %v284_v33, %v296_v34  ;;  %s1071_s13 = smov 8   ;;  %s1072_s26 = smov 16  }
  0x37   : > { %v305_v36 = vsel %vm304_vm3, 0.0, %v1068_v35  ;;  %s1073_s8 = smov 24  }
  0x38   : > { %765 = vmatmul.msk.bf16.vlgmr.msra.gmra.mxu0 %vm328_vm0, %v307_v3 }
  0xb5   : > { %v341_v5 = vpop.f32.mrf.mxu0 }
  0xb6   : > { %v342_v6 = vadd.f32 %v875_v4, %v341_v5 }
  0xb8   : > { %v345_v7 = vmul.f32 0.35355338, %v342_v6  ;;  %v347_v8 = vpack.c.bf16 %v342_v6, %v342_v6 }
  0xba   : > { %v346_v9 = vpack.c.bf16 %v345_v7, %v345_v7  ;;  %v349_v10 = vunpack.c.l.b16 %v347_v8 }
  0xbc   : > { %v1222_v11 = vpack.c.b16 %v349_v10, %v349_v10  ;;  %v411_v12 = vunpack.c.l.b16 %v346_v9 }
  0xbd   : > { %v343_v13 = vpop.f32.mrf.mxu0 }
  0xbe   : > { %351 = vrot.lane.b32.xlu0 %v1222_v11, %s1059_s17  ;;  %v412_v14 = vpack.c.b16 %v411_v12, %v411_v12  ;;  %s784_s17 = sshll.u32 %s1128_s25, 3  ;;  %s641_s25 = scalar_lea.sflag [#allocation5], %s1204_s22 }
  0xc0   : > { %539 = vrot.lane.b32.xlu2 %v412_v14, %s1060_s9  ;;  %413 = vrot.lane.b32.xlu1 %v412_v14, %s1061_s10 }
  0xc6   : > { %415 = vrot.lane.b32.xlu0 %v1222_v11, %s1062_s11  ;;  %s651_s11 = scalar_lea.hbm %s1301_s5, %s784_s17 }
  0xc8   : > { %478 = vrot.lane.b32.xlu2 %v1222_v11, %s1063_s14  ;;  %541 = vrot.lane.b32.xlu1 %v1222_v11, %s1064_s27 }
  0xce   : > { %476 = vrot.lane.b32.xlu0 %v412_v14, %s1065_s28  ;;  %s274_s28 = scalar_lea.vmem [#allocation9], %s753_s6  ;;  %s1003_s6 = scalar_lea.hbm %s1301_s5, 16 }
  0xd0   : > { %383 = vrot.lane.b32.xlu2 %v1222_v11, %s1066_s29  ;;  %s653_s29 = sshll.u32 %s274_s28, 4  ;;  %s654_s29 = int_to_ptr.vmem [resolvable:$true] %s653_s29 }
  0xd8   : > { %446 = vrot.lane.b32.xlu2 %v1222_v11, %s1067_s30  ;;  %s655_s30 = sshll.u32 %s651_s11, 4  ;;  %s656_s30 = int_to_ptr.hbm [resolvable:$true] %s655_s30 }
 0x11a   : > { %v540_v15 = vpop.permute.xlu2 %539 }
 0x122   : > { %v479_v16 = vpop.permute.xlu2 %478 }
 0x123   : > { %v484_v17 = vsel %vm353_vm1, %v479_v16, 0 }
 0x124   : > { %493 = vmatpush.bf16.xpose.msrb.mxu0 %v484_v17 }
 0x12a   : > { %v384_v18 = vpop.permute.xlu2 %383 }
 0x12b   : > { %v390_v19 = vsel %vm388_vm2, %v384_v18, 0 }
 0x12c   : > { %399 = vmatpush.bf16.msra.mxu2 %v390_v19 }
 0x130   : > { %v352_v20 = vpop.permute.xlu0 %351 }
 0x131   : > { %v358_v21 = vsel %vm353_vm1, %v352_v20, 0 }
 0x132   : > { %367 = vmatpush.bf16.xpose.msra.mxu1 %v358_v21  ;;  %v447_v22 = vpop.permute.xlu2 %446  ;;  %v414_v23 = vpop.permute.xlu1 %413 }
 0x133   : > { %v452_v24 = vsel %vm388_vm2, %v447_v22, 0 }
 0x134   : > { %461 = vmatpush.bf16.msrb.mxu2 %v452_v24 }
 0x138   : > { %v416_v25 = vpop.permute.xlu0 %415 }
 0x139   : > { %766 = vmatmul.msk.bf16.vlgmr.msra.gmra.mxu1 %vm353_vm1, %v346_v9  ;;  %v421_v26 = vsel %vm353_vm1, %v416_v25, 0 }
 0x13a   : > { %430 = vmatpush.bf16.xpose.msra.mxu3 %v421_v26  ;;  %v542_v27 = vpop.permute.xlu1 %541 }
 0x13b   : > { %v547_v28 = vsel %vm353_vm1, %v542_v27, 0 }
 0x140   : > { %v477_v29 = vpop.permute.xlu0 %476 }
 0x141   : > { %768 = vmatmul.msk.bf16.vlgmr.msra.gmra.mxu3 %vm353_vm1, %v414_v23  ;;  %770 = vmatmul.msk.bf16.vlgmr.msrb.gmra.mxu0 %vm353_vm1, %v477_v29 }
 0x142   : > { %556 = vmatpush.bf16.xpose.msrb.mxu3 %v547_v28 }
 0x151   : > { %772 = vmatmul.msk.bf16.vlgmr.msrb.gmra.mxu3 %vm353_vm1, %v540_v15 }
 0x1b6   : > { %v369_v37 = vpop.f32.mrf.mxu1 }
 0x1b7   : > { %v370_v38 = vadd.f32 %v369_v37, %v305_v36 }
 0x1b9   : > { %v373_v39 = vsel %vm353_vm1, %v370_v38, -inf }
 0x1ba   : > { %374 = vmax.xlane.f32.xlu1 %v373_v39 }
 0x1be   : > { %v371_v40 = vpop.f32.mrf.mxu1  ;;  %v495_v41 = vpop.f32.mrf.mxu0 }
 0x1bf   : > { %v496_v42 = vadd.f32 %v495_v41, %v305_v36  ;;  %v790_v41 = vld [vmem:[#allocation8 + $0x8] sm:$0xff] }
 0x1c0   : > { %632 = vmatpush.bf16.msra.mxu0 %v790_v41 }
 0x1c1   : > { %v499_v43 = vsel %vm353_vm1, %v496_v42, -inf }
 0x1c2   : > { %500 = vmax.xlane.f32.xlu1 %v499_v43 }
 0x1c4   : > { %v432_v44 = vpop.f32.mrf.mxu3 }
 0x1c5   : > { %v433_v45 = vadd.f32 %v432_v44, %v305_v36 }
 0x1c6   : > { %v497_v46 = vpop.f32.mrf.mxu0 }
 0x1c7   : > { %v436_v47 = vsel %vm353_vm1, %v433_v45, -inf }
 0x1c8   : > { %437 = vmax.xlane.f32.xlu0 %v436_v47  ;;  %v876_v47 = vld [vmem:[%s1300_s4] ss:$0 sm:$0xff] }
 0x1cc   : > { %v434_v48 = vpop.f32.mrf.mxu3 }
 0x1d4   : > { %v558_v49 = vpop.f32.mrf.mxu3 }
 0x1d5   : > { %v559_v50 = vadd.f32 %v558_v49, %v305_v36 }
 0x1d7   : > { %v562_v51 = vsel %vm353_vm1, %v559_v50, -inf }
 0x1d8   : > { %563 = vmax.xlane.f32.xlu2 %v562_v51 }
 0x1db   : > { %509 = vrot.lane.b32.xlu1 %v1222_v11, %s1069_s16  ;;  %s997_s16 = sshra.s32 %s656_s30, 4  ;;  %s998_s16 = int_to_ptr.hbm [resolvable:$true] %s997_s16 }
 0x1dc   : > { %572 = vrot.lane.b32.xlu0 %v1222_v11, %s1070_s7  ;;  %v560_v52 = vpop.f32.mrf.mxu3  ;;  %s999_s7 = scalar_lea.hbm %s998_s16, 8  ;;  %p1004_p12 = scmp.lt.s32.totalorder %s998_s16, %s1301_s5 }
 0x1dd   : > { %p1000_p1 = scmp.ne.s32.totalorder %s998_s16, %s999_s7  ;;  %p1005_p7 = scmp.lt.s32.totalorder %s1003_s6, %s999_s7 }
 0x1df   : > { %p1001_p3 = pnand %p1000_p1, %p1173_p4  ;;  %p1006_p8 = por %p1005_p7, %p1004_p12 }
 0x1e1   : > { %p1002_p5 = pneg %p1001_p3 }
 0x1e3   : > { %p1007_p9 = pnand %p1006_p8, %p1002_p5 }
 0x22d   : > { %v375_v53 = vpop.xlane.xlu1 %374 }
 0x22e   : > { %v376_v54 = vsub.f32 %v370_v38, %v375_v53 }
 0x230   : > { %v377_v55 = vmul.f32 1.442695, %v376_v54 }
 0x232   : > { %877 = vpow2.f32 %v377_v55 }
 0x235   : > { %v501_v58 = vpop.xlane.xlu1 %500 }
 0x236   : > { %v502_v61 = vsub.f32 %v496_v42, %v501_v58  ;;  %v789_v42 = vld [vmem:[#allocation8] sm:$0xff] }
 0x237   : > { %633 = vmatpush.bf16.msra.mxu0 %v789_v42 }
 0x238   : > { %v878_v56 = vpop.eup %877  ;;  %v503_v63 = vmul.f32 1.442695, %v502_v61 }
 0x239   : > { %v382_v57 = vpack.c.bf16 %v878_v56, %v878_v56  ;;  %v379_v15 = vsel %vm353_vm1, %v878_v56, 0.0 }
 0x23b   : > { %v438_v59 = vpop.xlane.xlu0 %437  ;;  %767 = vmatmul.msk.bf16.vlgmr.msra.gmra.mxu2 %vm353_vm1, %v382_v57 }
 0x23c   : > { %v439_v60 = vsub.f32 %v433_v45, %v438_v59 }
 0x23e   : > { %v440_v62 = vmul.f32 1.442695, %v439_v60 }
 0x240   : > { %879 = vpow2.f32 %v440_v62 }
 0x241   : > { %881 = vpow2.f32 %v503_v63 }
 0x246   : > { %v880_v0 = vpop.eup %879 }
 0x247   : > { %v442_v1 = vsel %vm353_vm1, %v880_v0, 0.0  ;;  %v445_v2 = vpack.c.bf16 %v880_v0, %v880_v0  ;;  %v882_v4 = vpop.eup %881 }
 0x248   : > { %443 = vadd.xlane.f32.xlu2 %v442_v1  ;;  %v505_v11 = vsel %vm353_vm1, %v882_v4, 0.0  ;;  %v508_v12 = vpack.c.bf16 %v882_v4, %v882_v4 }
 0x24b   : > { %v564_v3 = vpop.xlane.xlu2 %563  ;;  %769 = vmatmul.msk.bf16.vlgmr.msrb.gmra.mxu2 %vm353_vm1, %v445_v2 }
 0x24c   : > { %v565_v5 = vsub.f32 %v559_v50, %v564_v3 }
 0x24d   : > { %v510_v6 = vpop.permute.xlu1 %509 }
 0x24e   : > { %v566_v7 = vmul.f32 1.442695, %v565_v5  ;;  %v573_v8 = vpop.permute.xlu0 %572  ;;  %v515_v9 = vsel %vm388_vm2, %v510_v6, 0 }
 0x24f   : > { %v578_v10 = vsel %vm388_vm2, %v573_v8, 0  ;;  %524 = vmatpush.bf16.msrb.mxu1 %v515_v9 }
 0x250   : > { %883 = vpow2.f32 %v566_v7  ;;  %587 = vmatpush.bf16.msra.mxu2 %v578_v10  ;;  %506 = vadd.xlane.f32.xlu2 %v505_v11 }
 0x252   : > { %771 = vmatmul.msk.bf16.vlgmr.msrb.gmra.mxu1 %vm353_vm1, %v508_v12 }
 0x256   : > { %v884_v13 = vpop.eup %883 }
 0x257   : > { %v568_v14 = vsel %vm353_vm1, %v884_v13, 0.0  ;;  %v571_v16 = vpack.c.bf16 %v884_v13, %v884_v13 }
 0x258   : > { %569 = vadd.xlane.f32.xlu0 %v568_v14  ;;  %380 = vadd.xlane.f32.xlu2 %v379_v15 }
 0x25b   : > { %773 = vmatmul.msk.bf16.vlgmr.msra.gmra.mxu2 %vm353_vm1, %v571_v16 }
 0x2bb   : > { %v444_v17 = vpop.xlane.xlu2 %443 }
 0x2bc   : > { %885 = vrcp.f32 %v444_v17 }
 0x2be   : > { %v401_v18 = vpop.f32.mrf.mxu2 }
 0x2c2   : > { %v886_v22 = vpop.eup %885 }
 0x2c3   : > { %v507_v19 = vpop.xlane.xlu2 %506 }
 0x2c4   : > { %887 = vrcp.f32 %v507_v19 }
 0x2c6   : > { %v403_v20 = vpop.f32.mrf.mxu2 }
 0x2ca   : > { %v888_v24 = vpop.eup %887 }
 0x2cb   : > { %v381_v21 = vpop.xlane.xlu2 %380  ;;  %v570_v32 = vpop.xlane.xlu0 %569 }
 0x2cc   : > { %889 = vrcp.f32 %v381_v21 }
 0x2cd   : > { %891 = vrcp.f32 %v570_v32 }
 0x2ce   : > { %v463_v23 = vpop.f32.mrf.mxu2 }
 0x2cf   : > { %v468_v25 = vmul.f32 %v886_v22, %v463_v23  ;;  %v526_v26 = vpop.f32.mrf.mxu1 }
 0x2d0   : > { %v531_v27 = vmul.f32 %v888_v24, %v526_v26 }
 0x2d1   : > { %v469_v28 = vpack.c.bf16 %v468_v25, %v468_v25 }
 0x2d2   : > { %v532_v29 = vpack.c.bf16 %v531_v27, %v531_v27  ;;  %v890_v30 = vpop.eup %889 }
 0x2d3   : > { %471 = vrot.lane.b32.xlu1 %v469_v28, %s1071_s13  ;;  %v406_v31 = vmul.f32 %v890_v30, %v401_v18  ;;  %v892_v36 = vpop.eup %891 }
 0x2d4   : > { %534 = vrot.lane.b32.xlu2 %v532_v29, %s1072_s26 }
 0x2d5   : > { %v407_v33 = vpack.c.bf16 %v406_v31, %v406_v31 }
 0x2d6   : > { %v465_v34 = vpop.f32.mrf.mxu2 }
 0x2d7   : > { %v528_v35 = vpop.f32.mrf.mxu1  ;;  %409 = vst.msk [vmem:[#allocation2] sm:$0xf] %vm408_vm4, %v407_v33 }
 0x2de   : > { %v589_v37 = vpop.f32.mrf.mxu2 }
 0x2df   : > { %v594_v38 = vmul.f32 %v892_v36, %v589_v37 }
 0x2e1   : > { %v595_v39 = vpack.c.bf16 %v594_v38, %v594_v38 }
 0x2e3   : > { %597 = vrot.lane.b32.xlu1 %v595_v39, %s1073_s8 }
 0x2e6   : > { %v591_v40 = vpop.f32.mrf.mxu2 }
 0x32e   : > { %v535_v44 = vpop.permute.xlu2 %534 }
 0x345   : > { %v472_v43 = vpop.permute.xlu1 %471 }
 0x346   : > { %475 = vst.msk [vmem:[#allocation2] sm:$0xf] %vm474_vm5, %v472_v43 }
 0x347   : > { %538 = vst.msk [vmem:[#allocation2] sm:$0xf] %vm537_vm6, %v535_v44 }
 0x355   : > { %v598_v45 = vpop.permute.xlu1 %597 }
 0x356   : > { %601 = vst.msk [vmem:[#allocation2] sm:$0xf] %vm600_vm7, %v598_v45 }
 0x35d   : > { %v602_v46 = vld [vmem:[#allocation2] sm:$0xf] }
 0x35e   : > { %782 = vmatmul.msk.bf16.vlgmr.msra.gmra.mxu0 %vm328_vm0, %v602_v46 }
 0x3db   : > { %v635_v48 = vpop.f32.mrf.mxu0 }
 0x3dc   : > { %v636_v49 = vadd.f32 %v876_v47, %v635_v48 }
 0x3de   : > { %639 = vst.msk [vmem:[%s274_s28] sm:$0xff] %vm328_vm0, %v636_v49 }
 0x3df   : > { %1010 = shalt.err (!%p1007_p9)
}
 0x3e0   : > { %801 = dma.vmem_to_hbm [thread:$0]  (%p1173_p4), %s654_s29, 128, %s656_s30, %s641_s25  }
 0x3e3   : > { %v637_v50 = vpop.f32.mrf.mxu0 }
 0x3e4 PF: > { %s667_s22 = sand.u32 1, %s1041_s18   ;;  %p1308_p10 = scmp.ge.s32.totalorder %s1053_s21, 2 }
 0x3e5   : > { %s668_s9 = scalar_lea.sflag [#allocation5], %s667_s22 }
 0x3e6   : > { %p815_p13 = pnand %p1308_p10, %p1177_p6 }
 0x3e8   : > { %p816_p11 = pneg %p815_p13 }
 0x3ea   : > { %1036 = dma.done.wait (%p816_p11), %s668_s9, 128  }
 0x3eb   : > { %1038 = vsyncadd (%p816_p11), %s668_s9, 4294967168  ;;  %p19_p0 = scmp.ge.s32.totalorder %s1147_s12, 4   ;;  %s1309_s18 = smov %s1045_s19 }
 0x3ec   : > { %s1310_s19 = smov %s1049_s20  ;;  %s1311_s20 = smov %s1158_s15 }
 0x3ed   : > { %s1312_s21 = smov %s1147_s12  ;;  %21 = sbr.rel (!%p19_p0) target bundleno = 6 (0x6), region = 93 }
 0x3f2   :  { %674 = vsyncpa [#allocation4], 1 }
 0x3f3   :  { %676 = vsyncpa [#allocation4 + $0x1], 1 }
 0x3f4   :  { %677 = vsyncpa [#allocation7], 1 }
 0x3f5   :  { %678 = vsyncpa [#allocation5], 1 }
 0x3f6   :  { %680 = vsyncpa [#allocation5 + $0x1], 1 }

</bundles_post_ra>
